<compile_context>
chip_gen: v7x
topology: tpu7x:2x2x1
jax: 0.10.0
libtpu: 0.0.40
codegen_flags: <defaults>
</compile_context>

<pallas_src>
import numpy as np
import jax
import jax.numpy as jnp
from jax.experimental import pallas as pl
from jax.experimental.pallas import tpu as pltpu

# ---------------- static configuration ----------------
PARAM_CH   = 6
LATENT_CH  = 2
IN_CH      = PARAM_CH + LATENT_CH                       # 8
N_FREQS    = 4
FREQ_BANDS = tuple(2.0 ** k for k in range(1, N_FREQS + 1))   # 2, 4, 8, 16 (python floats)
PE_OUT     = PARAM_CH * (2 * N_FREQS + 1)               # 54
MLP0_IN    = PE_OUT + LATENT_CH                         # 56
W_HID      = 64
TFORM_OUT  = 3
PRED_CH    = TFORM_OUT * PARAM_CH                       # 18
GROUP      = 8                                          # padded pred group size
PRED_PAD   = TFORM_OUT * GROUP                          # 24
OUT_CH     = TFORM_OUT                                  # 3
NEG_SLOPE  = 0.01
HIGHEST    = jax.lax.Precision.HIGHEST


def _leaky_relu(h):
    return jnp.where(h > 0, h, NEG_SLOPE * h)


def _build_pe_perm():
    """perm[k] = original (PyTorch) layer-0 input index feeding kernel feature k.

    PyTorch layer-0 input order : [x | sin(2x) cos(2x) | sin(4x) cos(4x) | ... | latent]
    Kernel layer-0 input order  : [x(6) latent(2) | sin(2x) sin(4x) sin(8x) sin(16x) | cos(...)]
    (8/24/24 sublane-aligned groups.)
    """
    perm = list(range(PARAM_CH))                              # params 0..5
    perm += list(range(PE_OUT, PE_OUT + LATENT_CH))           # latent 54, 55
    for j in range(N_FREQS):                                  # sin blocks
        base = PARAM_CH + 2 * PARAM_CH * j
        perm += list(range(base, base + PARAM_CH))
    for j in range(N_FREQS):                                  # cos blocks
        base = PARAM_CH + 2 * PARAM_CH * j + PARAM_CH
        perm += list(range(base, base + PARAM_CH))
    return np.asarray(perm, dtype=np.int32)


_PE_PERM = _build_pe_perm()


# ---------------- Pallas kernel ----------------
def local_affine_kernel(x_ref, w0_ref, b0_ref, w1_ref, b1_ref, w2_ref, b2_ref, out_ref):
    x = x_ref[...]                                   # (8, TB) f32; rows = [params(6) | latent(2)]
    params = x[:PARAM_CH, :]                         # (6, TB) f32, kept f32 for the affine tail

    # --- WindowedPE (max_freq_iter == 0 -> all frequency weights are 1) ---
    # Frequencies are python scalars, so no array constants are captured by the kernel.
    scaled = jnp.concatenate([f * params for f in FREQ_BANDS], axis=0)     # (24, TB)
    s = jnp.sin(scaled)                              # lane-dense EUP passes
    c = jnp.cos(scaled)

    # Kernel-internal feature order [x(8) | sin(24) | cos(24)]; W0 columns are permuted
    # host-side to match.  Cast pieces to bf16 before the concat (halves bytes of h).
    h = jnp.concatenate([x.astype(jnp.bfloat16),
                         s.astype(jnp.bfloat16),
                         c.astype(jnp.bfloat16)], axis=0)                  # (56, TB) bf16

    # --- MLP (D = 3): W @ h, batch on the MXU N axis, bf16 operands, f32 accumulation ---
    h = jnp.dot(w0_ref[...], h, preferred_element_type=jnp.float32) + b0_ref[...]
    h = _leaky_relu(h)                                                     # (64, TB) f32
    h = jnp.dot(w1_ref[...], h.astype(jnp.bfloat16),
                preferred_element_type=jnp.float32) + b1_ref[...]
    h = _leaky_relu(h)                                                     # (64, TB) f32
    pred = jnp.dot(w2_ref[...], h.astype(jnp.bfloat16),
                   preferred_element_type=jnp.float32) + b2_ref[...]       # (24, TB) f32

    # --- per-sample local affine transform: out[i] = sum_j tform[i, j] * params[j] ---
    # pred rows were padded to 8-per-output-group host-side (rows 6,7 of each group are 0);
    # tail is pure lane-dense VPU multiply-adds, no cross-lane reductions.
    rows = []
    for i in range(TFORM_OUT):
        acc = pred[GROUP * i:GROUP * i + 1, :] * params[0:1, :]
        for j in range(1, PARAM_CH):
            acc = acc + pred[GROUP * i + j:GROUP * i + j + 1, :] * params[j:j + 1, :]
        rows.append(acc)
    out_ref[...] = jnp.concatenate(rows, axis=0)     # (3, TB), lane-dense store


# ---------------- host-side weight prep (one-time, hoisted out of the call path) ----------------
def prepare_kernel_weights(w0, b0, w1, b1, w2, b2):
    """Inputs in reference layout: wN is (in, out), bN is (1, out).

    Returns kernel-layout weights: wNk is (out, in) bf16 (layer-0 columns PE-permuted,
    layer-2 outputs padded 18->24 in 8-row groups), bNk is (out, 1) f32.
    """
    w0k = jnp.asarray(w0)[_PE_PERM, :].T.astype(jnp.bfloat16)              # (64, 56)
    b0k = jnp.asarray(b0).T.astype(jnp.float32)                            # (64, 1)
    w1k = jnp.asarray(w1).T.astype(jnp.bfloat16)                           # (64, 64)
    b1k = jnp.asarray(b1).T.astype(jnp.float32)                            # (64, 1)
    w2t = jnp.asarray(w2).T.reshape(TFORM_OUT, PARAM_CH, W_HID)            # (3, 6, 64)
    w2k = jnp.pad(w2t, ((0, 0), (0, GROUP - PARAM_CH), (0, 0)))
    w2k = w2k.reshape(PRED_PAD, W_HID).astype(jnp.bfloat16)                # (24, 64)
    b2t = jnp.asarray(b2).T.reshape(TFORM_OUT, PARAM_CH, 1)
    b2k = jnp.pad(b2t, ((0, 0), (0, GROUP - PARAM_CH), (0, 0)))
    b2k = b2k.reshape(PRED_PAD, 1).astype(jnp.float32)                     # (24, 1)
    return (w0k, b0k, w1k, b1k, w2k, b2k)


def _choose_tile_b(B, tile_b):
    # Batch lives on the 128-lane axis -> tiles must be multiples of 128.
    tile_b = max(128, (int(tile_b) // 128) * 128)
    b128 = pl.cdiv(B, 128) * 128                 # batch rounded up to a lane multiple
    tile_b = min(tile_b, b128)                   # don't tile past the batch
    # v7x megacore: keep grid >= 2 when possible so the "parallel" axis shards over both TCs.
    if b128 >= 256 and pl.cdiv(b128, tile_b) < 2:
        tile_b = max(128, (b128 // 2 // 128) * 128)
    return tile_b


# ---------------- wrapper ----------------
def local_affine_embedding(x, kernel_weights, *, tile_b=2048):
    """x: (B, 8) f32.  kernel_weights: output of prepare_kernel_weights()."""
    w0k, b0k, w1k, b1k, w2k, b2k = kernel_weights
    B = x.shape[0]
    tile_b = _choose_tile_b(B, tile_b)
    grid_b = pl.cdiv(B, tile_b)
    Bp = grid_b * tile_b

    # Batch-in-lanes layout: (IN_CH, Bp).  Zero padding rows are numerically safe.
    xt = jnp.pad(x, ((0, Bp - B), (0, 0))).T

    full = lambda i: (0, 0)                      # weights/biases stay VMEM-resident
    out_t = pl.pallas_call(
        local_affine_kernel,
        out_shape=jax.ShapeDtypeStruct((OUT_CH, Bp), jnp.float32),
        grid_spec=pltpu.PrefetchScalarGridSpec(
            num_scalar_prefetch=0,
            grid=(grid_b,),
            in_specs=[
                pl.BlockSpec((IN_CH, tile_b), lambda i: (0, i)),
                pl.BlockSpec((W_HID, MLP0_IN), full),
                pl.BlockSpec((W_HID, 1), full),
                pl.BlockSpec((W_HID, W_HID), full),
                pl.BlockSpec((W_HID, 1), full),
                pl.BlockSpec((PRED_PAD, W_HID), full),
                pl.BlockSpec((PRED_PAD, 1), full),
            ],
            out_specs=pl.BlockSpec((OUT_CH, tile_b), lambda i: (0, i)),
        ),
        compiler_params=pltpu.CompilerParams(dimension_semantics=("parallel",)),
    )(xt, w0k, b0k, w1k, b1k, w2k, b2k)
    return out_t.T[:B]                           # tiny (B, 3) transpose back


# ---------------- pure-JAX f32 reference (PyTorch ordering / layout) ----------------
def reference_forward(x, w0, b0, w1, b1, w2, b2):
    params, latent = x[:, :PARAM_CH], x[:, PARAM_CH:]
    feats = [params]
    for f in FREQ_BANDS:
        feats += [jnp.sin(f * params), jnp.cos(f * params)]
    h = jnp.concatenate(feats + [latent], axis=-1)
    h = _leaky_relu(jnp.dot(h, w0, precision=HIGHEST) + b0)
    h = _leaky_relu(jnp.dot(h, w1, precision=HIGHEST) + b1)
    pred = jnp.dot(h, w2, precision=HIGHEST) + b2
    tform = pred.reshape(-1, TFORM_OUT, PARAM_CH)
    return jnp.einsum('bij,bj->bi', tform, params, precision=HIGHEST)


# ---------------- deterministic parameter init (PyTorch Linear-style) ----------------
def init_linear(key, fan_in, fan_out):
    kw, kb = jax.random.split(key)
    bound = 1.0 / np.sqrt(fan_in)
    w = jax.random.uniform(kw, (fan_in, fan_out), jnp.float32, -bound, bound)
    b = jax.random.uniform(kb, (1, fan_out), jnp.float32, -bound, bound)
    return w, b


if __name__ == "__main__":
    key = jax.random.PRNGKey(0)
    kx, k0, k1, k2 = jax.random.split(key, 4)

    B = 500                                   # ragged on purpose (exercises padding + grid>=2)
    x = jax.random.normal(kx, (B, IN_CH), jnp.float32)

    w0, b0 = init_linear(k0, MLP0_IN, W_HID)
    w1, b1 = init_linear(k1, W_HID, W_HID)
    w2, b2 = init_linear(k2, W_HID, PRED_CH)

    kweights = prepare_kernel_weights(w0, b0, w1, b1, w2, b2)    # one-time prep, hoisted
    out = local_affine_embedding(x, kweights, tile_b=256)        # grid = 2
    out = jax.block_until_ready(out)

    ref = reference_forward(x, w0, b0, w1, b1, w2, b2)
    err = float(jnp.max(jnp.abs(out - ref)))
    assert out.shape == (B, OUT_CH), out.shape
    # bf16 MXU operands vs f32 reference: documented precision/perf trade-off.
    assert err < 1e-1, f"max abs error {err}"
    print("KERNEL_OK")
</pallas_src>

<mosaic_0001>
module attributes {stable_mosaic.version = 11 : i64} {
  func.func @local_affine_kernel(%arg0: i32, %arg1: memref<8x256xf32, #tpu.memory_space<vmem>>, %arg2: memref<64x56xbf16, #tpu.memory_space<vmem>>, %arg3: memref<64x1xf32, #tpu.memory_space<vmem>>, %arg4: memref<64x64xbf16, #tpu.memory_space<vmem>>, %arg5: memref<64x1xf32, #tpu.memory_space<vmem>>, %arg6: memref<24x64xbf16, #tpu.memory_space<vmem>>, %arg7: memref<24x1xf32, #tpu.memory_space<vmem>>, %arg8: memref<3x256xf32, #tpu.memory_space<vmem>>) attributes {dimension_semantics = [#tpu.dimension_semantics<parallel>], iteration_bounds = array<i64: 2>, scalar_prefetch = 0 : i64, scratch_operands = 0 : i64, tpu.core_type = #tpu.core_type<tc>, window_params = [{transform_indices = @transform_0, window_bounds = array<i64: 8, 256>}, {pipeline_mode = #tpu.pipeline_mode<synchronous>, transform_indices = @transform_1, window_bounds = array<i64: 64, 56>}, {pipeline_mode = #tpu.pipeline_mode<synchronous>, transform_indices = @transform_2, window_bounds = array<i64: 64, 1>}, {pipeline_mode = #tpu.pipeline_mode<synchronous>, transform_indices = @transform_3, window_bounds = array<i64: 64, 64>}, {pipeline_mode = #tpu.pipeline_mode<synchronous>, transform_indices = @transform_4, window_bounds = array<i64: 64, 1>}, {pipeline_mode = #tpu.pipeline_mode<synchronous>, transform_indices = @transform_5, window_bounds = array<i64: 24, 64>}, {pipeline_mode = #tpu.pipeline_mode<synchronous>, transform_indices = @transform_6, window_bounds = array<i64: 24, 1>}, {transform_indices = @transform_7, window_bounds = array<i64: 3, 256>}]} {
    %c0 = arith.constant 0 : index
    %c0_0 = arith.constant 0 : index
    %0 = vector.load %arg1[%c0, %c0_0] : memref<8x256xf32, #tpu.memory_space<vmem>>, vector<8x256xf32>
    %1 = vector.extract_strided_slice %0 {offsets = [0, 0], sizes = [6, 256], strides = [1, 1]} : vector<8x256xf32> to vector<6x256xf32>
    %cst = arith.constant 2.000000e+00 : f32
    %2 = vector.broadcast %cst : f32 to vector<6x256xf32>
    %3 = arith.mulf %2, %1 : vector<6x256xf32>
    %cst_1 = arith.constant 4.000000e+00 : f32
    %4 = vector.broadcast %cst_1 : f32 to vector<6x256xf32>
    %5 = arith.mulf %4, %1 : vector<6x256xf32>
    %cst_2 = arith.constant 8.000000e+00 : f32
    %6 = vector.broadcast %cst_2 : f32 to vector<6x256xf32>
    %7 = arith.mulf %6, %1 : vector<6x256xf32>
    %cst_3 = arith.constant 1.600000e+01 : f32
    %8 = vector.broadcast %cst_3 : f32 to vector<6x256xf32>
    %9 = arith.mulf %8, %1 : vector<6x256xf32>
    %10 = tpu.concatenate %3, %5, %7, %9 in 0 : vector<6x256xf32>, vector<6x256xf32>, vector<6x256xf32>, vector<6x256xf32> -> vector<24x256xf32>
    %11 = math.sin %10 : vector<24x256xf32>
    %12 = math.cos %10 : vector<24x256xf32>
    %13 = arith.truncf %0 : vector<8x256xf32> to vector<8x256xbf16>
    %14 = arith.truncf %11 : vector<24x256xf32> to vector<24x256xbf16>
    %15 = arith.truncf %12 : vector<24x256xf32> to vector<24x256xbf16>
    %16 = tpu.concatenate %13, %14, %15 in 0 : vector<8x256xbf16>, vector<24x256xbf16>, vector<24x256xbf16> -> vector<56x256xbf16>
    %c0_4 = arith.constant 0 : index
    %c0_5 = arith.constant 0 : index
    %17 = vector.load %arg2[%c0_4, %c0_5] : memref<64x56xbf16, #tpu.memory_space<vmem>>, vector<64x56xbf16>
    %cst_6 = arith.constant dense<0.000000e+00> : vector<64x256xf32>
    %18 = tpu.matmul %17, %16, %cst_6 {dimension_numbers = #tpu.dot_dimension_numbers<[1], [0], [0], [1], [0, 0, 1, 1], [], []>} : vector<64x56xbf16>, vector<56x256xbf16>, vector<64x256xf32> -> vector<64x256xf32>
    %c0_7 = arith.constant 0 : index
    %c0_8 = arith.constant 0 : index
    %19 = vector.load %arg3[%c0_7, %c0_8] : memref<64x1xf32, #tpu.memory_space<vmem>>, vector<64x1xf32>
    %20 = vector.broadcast %19 : vector<64x1xf32> to vector<64x256xf32>
    %21 = arith.addf %18, %20 : vector<64x256xf32>
    %cst_9 = arith.constant 0.000000e+00 : f32
    %22 = vector.broadcast %cst_9 : f32 to vector<64x256xf32>
    %23 = arith.cmpf ogt, %21, %22 : vector<64x256xf32>
    %cst_10 = arith.constant 0.00999999977 : f32
    %24 = vector.broadcast %cst_10 : f32 to vector<64x256xf32>
    %25 = arith.mulf %24, %21 : vector<64x256xf32>
    %26 = arith.select %23, %21, %25 : vector<64x256xi1>, vector<64x256xf32>
    %c0_11 = arith.constant 0 : index
    %c0_12 = arith.constant 0 : index
    %27 = vector.load %arg4[%c0_11, %c0_12] : memref<64x64xbf16, #tpu.memory_space<vmem>>, vector<64x64xbf16>
    %28 = arith.truncf %26 : vector<64x256xf32> to vector<64x256xbf16>
    %cst_13 = arith.constant dense<0.000000e+00> : vector<64x256xf32>
    %29 = tpu.matmul %27, %28, %cst_13 {dimension_numbers = #tpu.dot_dimension_numbers<[1], [0], [0], [1], [0, 0, 1, 1], [], []>} : vector<64x64xbf16>, vector<64x256xbf16>, vector<64x256xf32> -> vector<64x256xf32>
    %c0_14 = arith.constant 0 : index
    %c0_15 = arith.constant 0 : index
    %30 = vector.load %arg5[%c0_14, %c0_15] : memref<64x1xf32, #tpu.memory_space<vmem>>, vector<64x1xf32>
    %31 = vector.broadcast %30 : vector<64x1xf32> to vector<64x256xf32>
    %32 = arith.addf %29, %31 : vector<64x256xf32>
    %cst_16 = arith.constant 0.000000e+00 : f32
    %33 = vector.broadcast %cst_16 : f32 to vector<64x256xf32>
    %34 = arith.cmpf ogt, %32, %33 : vector<64x256xf32>
    %cst_17 = arith.constant 0.00999999977 : f32
    %35 = vector.broadcast %cst_17 : f32 to vector<64x256xf32>
    %36 = arith.mulf %35, %32 : vector<64x256xf32>
    %37 = arith.select %34, %32, %36 : vector<64x256xi1>, vector<64x256xf32>
    %c0_18 = arith.constant 0 : index
    %c0_19 = arith.constant 0 : index
    %38 = vector.load %arg6[%c0_18, %c0_19] : memref<24x64xbf16, #tpu.memory_space<vmem>>, vector<24x64xbf16>
    %39 = arith.truncf %37 : vector<64x256xf32> to vector<64x256xbf16>
    %cst_20 = arith.constant dense<0.000000e+00> : vector<24x256xf32>
    %40 = tpu.matmul %38, %39, %cst_20 {dimension_numbers = #tpu.dot_dimension_numbers<[1], [0], [0], [1], [0, 0, 1, 1], [], []>} : vector<24x64xbf16>, vector<64x256xbf16>, vector<24x256xf32> -> vector<24x256xf32>
    %c0_21 = arith.constant 0 : index
    %c0_22 = arith.constant 0 : index
    %41 = vector.load %arg7[%c0_21, %c0_22] : memref<24x1xf32, #tpu.memory_space<vmem>>, vector<24x1xf32>
    %42 = vector.broadcast %41 : vector<24x1xf32> to vector<24x256xf32>
    %43 = arith.addf %40, %42 : vector<24x256xf32>
    %44 = vector.extract_strided_slice %43 {offsets = [0, 0], sizes = [1, 256], strides = [1, 1]} : vector<24x256xf32> to vector<1x256xf32>
    %45 = vector.extract_strided_slice %1 {offsets = [0, 0], sizes = [1, 256], strides = [1, 1]} : vector<6x256xf32> to vector<1x256xf32>
    %46 = arith.mulf %44, %45 : vector<1x256xf32>
    %47 = vector.extract_strided_slice %43 {offsets = [1, 0], sizes = [1, 256], strides = [1, 1]} : vector<24x256xf32> to vector<1x256xf32>
    %48 = vector.extract_strided_slice %1 {offsets = [1, 0], sizes = [1, 256], strides = [1, 1]} : vector<6x256xf32> to vector<1x256xf32>
    %49 = arith.mulf %47, %48 : vector<1x256xf32>
    %50 = arith.addf %46, %49 : vector<1x256xf32>
    %51 = vector.extract_strided_slice %43 {offsets = [2, 0], sizes = [1, 256], strides = [1, 1]} : vector<24x256xf32> to vector<1x256xf32>
    %52 = vector.extract_strided_slice %1 {offsets = [2, 0], sizes = [1, 256], strides = [1, 1]} : vector<6x256xf32> to vector<1x256xf32>
    %53 = arith.mulf %51, %52 : vector<1x256xf32>
    %54 = arith.addf %50, %53 : vector<1x256xf32>
    %55 = vector.extract_strided_slice %43 {offsets = [3, 0], sizes = [1, 256], strides = [1, 1]} : vector<24x256xf32> to vector<1x256xf32>
    %56 = vector.extract_strided_slice %1 {offsets = [3, 0], sizes = [1, 256], strides = [1, 1]} : vector<6x256xf32> to vector<1x256xf32>
    %57 = arith.mulf %55, %56 : vector<1x256xf32>
    %58 = arith.addf %54, %57 : vector<1x256xf32>
    %59 = vector.extract_strided_slice %43 {offsets = [4, 0], sizes = [1, 256], strides = [1, 1]} : vector<24x256xf32> to vector<1x256xf32>
    %60 = vector.extract_strided_slice %1 {offsets = [4, 0], sizes = [1, 256], strides = [1, 1]} : vector<6x256xf32> to vector<1x256xf32>
    %61 = arith.mulf %59, %60 : vector<1x256xf32>
    %62 = arith.addf %58, %61 : vector<1x256xf32>
    %63 = vector.extract_strided_slice %43 {offsets = [5, 0], sizes = [1, 256], strides = [1, 1]} : vector<24x256xf32> to vector<1x256xf32>
    %64 = vector.extract_strided_slice %1 {offsets = [5, 0], sizes = [1, 256], strides = [1, 1]} : vector<6x256xf32> to vector<1x256xf32>
    %65 = arith.mulf %63, %64 : vector<1x256xf32>
    %66 = arith.addf %62, %65 : vector<1x256xf32>
    %67 = vector.extract_strided_slice %43 {offsets = [8, 0], sizes = [1, 256], strides = [1, 1]} : vector<24x256xf32> to vector<1x256xf32>
    %68 = vector.extract_strided_slice %1 {offsets = [0, 0], sizes = [1, 256], strides = [1, 1]} : vector<6x256xf32> to vector<1x256xf32>
    %69 = arith.mulf %67, %68 : vector<1x256xf32>
    %70 = vector.extract_strided_slice %43 {offsets = [9, 0], sizes = [1, 256], strides = [1, 1]} : vector<24x256xf32> to vector<1x256xf32>
    %71 = vector.extract_strided_slice %1 {offsets = [1, 0], sizes = [1, 256], strides = [1, 1]} : vector<6x256xf32> to vector<1x256xf32>
    %72 = arith.mulf %70, %71 : vector<1x256xf32>
    %73 = arith.addf %69, %72 : vector<1x256xf32>
    %74 = vector.extract_strided_slice %43 {offsets = [10, 0], sizes = [1, 256], strides = [1, 1]} : vector<24x256xf32> to vector<1x256xf32>
    %75 = vector.extract_strided_slice %1 {offsets = [2, 0], sizes = [1, 256], strides = [1, 1]} : vector<6x256xf32> to vector<1x256xf32>
    %76 = arith.mulf %74, %75 : vector<1x256xf32>
    %77 = arith.addf %73, %76 : vector<1x256xf32>
    %78 = vector.extract_strided_slice %43 {offsets = [11, 0], sizes = [1, 256], strides = [1, 1]} : vector<24x256xf32> to vector<1x256xf32>
    %79 = vector.extract_strided_slice %1 {offsets = [3, 0], sizes = [1, 256], strides = [1, 1]} : vector<6x256xf32> to vector<1x256xf32>
    %80 = arith.mulf %78, %79 : vector<1x256xf32>
    %81 = arith.addf %77, %80 : vector<1x256xf32>
    %82 = vector.extract_strided_slice %43 {offsets = [12, 0], sizes = [1, 256], strides = [1, 1]} : vector<24x256xf32> to vector<1x256xf32>
    %83 = vector.extract_strided_slice %1 {offsets = [4, 0], sizes = [1, 256], strides = [1, 1]} : vector<6x256xf32> to vector<1x256xf32>
    %84 = arith.mulf %82, %83 : vector<1x256xf32>
    %85 = arith.addf %81, %84 : vector<1x256xf32>
    %86 = vector.extract_strided_slice %43 {offsets = [13, 0], sizes = [1, 256], strides = [1, 1]} : vector<24x256xf32> to vector<1x256xf32>
    %87 = vector.extract_strided_slice %1 {offsets = [5, 0], sizes = [1, 256], strides = [1, 1]} : vector<6x256xf32> to vector<1x256xf32>
    %88 = arith.mulf %86, %87 : vector<1x256xf32>
    %89 = arith.addf %85, %88 : vector<1x256xf32>
    %90 = vector.extract_strided_slice %43 {offsets = [16, 0], sizes = [1, 256], strides = [1, 1]} : vector<24x256xf32> to vector<1x256xf32>
    %91 = vector.extract_strided_slice %1 {offsets = [0, 0], sizes = [1, 256], strides = [1, 1]} : vector<6x256xf32> to vector<1x256xf32>
    %92 = arith.mulf %90, %91 : vector<1x256xf32>
    %93 = vector.extract_strided_slice %43 {offsets = [17, 0], sizes = [1, 256], strides = [1, 1]} : vector<24x256xf32> to vector<1x256xf32>
    %94 = vector.extract_strided_slice %1 {offsets = [1, 0], sizes = [1, 256], strides = [1, 1]} : vector<6x256xf32> to vector<1x256xf32>
    %95 = arith.mulf %93, %94 : vector<1x256xf32>
    %96 = arith.addf %92, %95 : vector<1x256xf32>
    %97 = vector.extract_strided_slice %43 {offsets = [18, 0], sizes = [1, 256], strides = [1, 1]} : vector<24x256xf32> to vector<1x256xf32>
    %98 = vector.extract_strided_slice %1 {offsets = [2, 0], sizes = [1, 256], strides = [1, 1]} : vector<6x256xf32> to vector<1x256xf32>
    %99 = arith.mulf %97, %98 : vector<1x256xf32>
    %100 = arith.addf %96, %99 : vector<1x256xf32>
    %101 = vector.extract_strided_slice %43 {offsets = [19, 0], sizes = [1, 256], strides = [1, 1]} : vector<24x256xf32> to vector<1x256xf32>
    %102 = vector.extract_strided_slice %1 {offsets = [3, 0], sizes = [1, 256], strides = [1, 1]} : vector<6x256xf32> to vector<1x256xf32>
    %103 = arith.mulf %101, %102 : vector<1x256xf32>
    %104 = arith.addf %100, %103 : vector<1x256xf32>
    %105 = vector.extract_strided_slice %43 {offsets = [20, 0], sizes = [1, 256], strides = [1, 1]} : vector<24x256xf32> to vector<1x256xf32>
    %106 = vector.extract_strided_slice %1 {offsets = [4, 0], sizes = [1, 256], strides = [1, 1]} : vector<6x256xf32> to vector<1x256xf32>
    %107 = arith.mulf %105, %106 : vector<1x256xf32>
    %108 = arith.addf %104, %107 : vector<1x256xf32>
    %109 = vector.extract_strided_slice %43 {offsets = [21, 0], sizes = [1, 256], strides = [1, 1]} : vector<24x256xf32> to vector<1x256xf32>
    %110 = vector.extract_strided_slice %1 {offsets = [5, 0], sizes = [1, 256], strides = [1, 1]} : vector<6x256xf32> to vector<1x256xf32>
    %111 = arith.mulf %109, %110 : vector<1x256xf32>
    %112 = arith.addf %108, %111 : vector<1x256xf32>
    %113 = tpu.concatenate %66, %89, %112 in 0 : vector<1x256xf32>, vector<1x256xf32>, vector<1x256xf32> -> vector<3x256xf32>
    %c0_23 = arith.constant 0 : index
    %c0_24 = arith.constant 0 : index
    %114 = vector.load %arg8[%c0_23, %c0_24] : memref<3x256xf32, #tpu.memory_space<vmem>>, vector<3x256xf32>
    tpu.vector_store %arg8[%c0_23, %c0_24], %113 {strides = array<i32>} : memref<3x256xf32, #tpu.memory_space<vmem>>, vector<3x256xf32>,
    return
  }
  func.func @transform_0(%arg0: i32) -> (i32, i32) {
    %c0_i32 = arith.constant 0 : i32
    %c0_i32_0 = arith.constant 0 : i32
    return %c0_i32, %arg0 : i32, i32
  }
  func.func @transform_1(%arg0: i32) -> (i32, i32) {
    %c0_i32 = arith.constant 0 : i32
    %c0_i32_0 = arith.constant 0 : i32
    %c0_i32_1 = arith.constant 0 : i32
    return %c0_i32, %c0_i32_0 : i32, i32
  }
  func.func @transform_2(%arg0: i32) -> (i32, i32) {
    %c0_i32 = arith.constant 0 : i32
    %c0_i32_0 = arith.constant 0 : i32
    %c0_i32_1 = arith.constant 0 : i32
    return %c0_i32, %c0_i32_0 : i32, i32
  }
  func.func @transform_3(%arg0: i32) -> (i32, i32) {
    %c0_i32 = arith.constant 0 : i32
    %c0_i32_0 = arith.constant 0 : i32
    %c0_i32_1 = arith.constant 0 : i32
    return %c0_i32, %c0_i32_0 : i32, i32
  }
  func.func @transform_4(%arg0: i32) -> (i32, i32) {
    %c0_i32 = arith.constant 0 : i32
    %c0_i32_0 = arith.constant 0 : i32
    %c0_i32_1 = arith.constant 0 : i32
    return %c0_i32, %c0_i32_0 : i32, i32
  }
  func.func @transform_5(%arg0: i32) -> (i32, i32) {
    %c0_i32 = arith.constant 0 : i32
    %c0_i32_0 = arith.constant 0 : i32
    %c0_i32_1 = arith.constant 0 : i32
    return %c0_i32, %c0_i32_0 : i32, i32
  }
  func.func @transform_6(%arg0: i32) -> (i32, i32) {
    %c0_i32 = arith.constant 0 : i32
    %c0_i32_0 = arith.constant 0 : i32
    %c0_i32_1 = arith.constant 0 : i32
    return %c0_i32, %c0_i32_0 : i32, i32
  }
  func.func @transform_7(%arg0: i32) -> (i32, i32) {
    %c0_i32 = arith.constant 0 : i32
    %c0_i32_0 = arith.constant 0 : i32
    return %c0_i32, %arg0 : i32, i32
  }
}

</mosaic_0001>

<bundles_post_ra>
// kernel: tpu_custom_call.1
= control target key start
LH: loop header
LB: loop body
LE: loop exit
PB: predicated region body
PF: predicated region fallthrough
CT: control target
= control target key end

     0   :  { %12 = vsyncpa [#allocation3], 0  ;;  %s3557_s0 = inlined_call_operand.vmem [shape: f32[8,512], index: 0, kind: input, shape index: {}]   ;;  %s3558_s1 = inlined_call_operand.vmem [shape: bf16[64,56], index: 1, kind: input, shape index: {}]   ;;  %s3559_s2 = inlined_call_operand.vmem [shape: f32[64,1], index: 2, kind: input, shape index: {}]   ;;  %s3560_s3 = inlined_call_operand.vmem [shape: bf16[64,64], index: 3, kind: input, shape index: {}]   ;;  %s3561_s4 = inlined_call_operand.vmem [shape: f32[64,1], index: 4, kind: input, shape index: {}]   ;;  %s3562_s5 = inlined_call_operand.vmem [shape: bf16[24,64], index: 5, kind: input, shape index: {}]   ;;  %s3563_s6 = inlined_call_operand.vmem [shape: f32[24,1], index: 6, kind: input, shape index: {}]   ;;  %s3564_s7 = inlined_call_operand.hbm [shape: f32[3,512], index: 7, kind: output, shape index: {}]  }
   0x1   :  { %14 = vsyncpa [#allocation3 + $0x1], 0  ;;  %s2627_s24 = smov 0   ;;  %s2629_s25 = smov 0  }
   0x2   :  { %s2631_s26 = smov 0   ;;  %s2633_s27 = smov 0  }
   0x3 LB: > { %s2648_s28 = sadd.s32 4294967295, %s2577_s27   ;;  %s2317_s29 = sadd.s32 4294967294, %s2577_s27   ;;  %s2577_s27 = sphi %s2633_s27, %s3580_s27   ;;  %s2573_s26 = sphi %s2631_s26, %s3579_s26   ;;  %s2569_s25 = sphi %s2629_s25, %s3578_s25   ;;  %s2565_s24 = sphi %s2627_s24, %s3577_s24  }
   0x4   : > { %s2652_s30 = sadd.s32 1, %s2577_s27   ;;  %s179_s8 = sadd.s32 1, %s2573_s26 }
   0x5   : > { %s176_s9 = ssub.s32 %s2577_s27, %s2652_s30  ;;  %p189_p0 = scmp.ne.s32.totalorder %s2573_s26, %s2569_s25 }
   0x6   : > { %p177_p1 = scmp.eq.s32.totalorder %s176_s9, 0  ;;  %p190_p2 = scmp.eq.s32.totalorder %s2648_s28, 1 }
   0x7   : > { %p195_p3 = scmp.ne.s32.totalorder %s2569_s25, %s2565_s24  ;;  %p196_p4 = scmp.eq.s32.totalorder %s2317_s29, 1 }
   0x8   : > { %s2663_s10 = scalar_select %p177_p1, %s2573_s26, %s179_s8  }
   0x9   : > { %p2665_p5 = por %p190_p2, %p189_p0  ;;  %p2669_p6 = por %p196_p4, %p195_p3 }
   0xa   : > { %p2320_p7 = scmp.ge.s32.totalorder %s2577_s27, 1  ;;  %p241_p8 = scmp.lt.s32.totalorder %s2577_s27, 3 }
   0xc   : > { %p242_p9 = pnand %p2320_p7, %p241_p8 }
   0xd   : > { %s2322_s13 = sshll.u32 (!%p242_p9), %s2648_s28, 1  ;;  %vm309_vm0 = vcmask (!%p242_p9), 1045504   ;;  %vm312_vm1 = vcmask (!%p242_p9), 1043456   ;;  %v2579_v42 = vmov (!%p242_p9), 683565275   ;;  %s2398_s8 = sshll.u32 (!%p242_p9), %s2648_s28, 7 }
   0xe   : > { %245 = sbr.rel (%p242_p9) target bundleno = 1000 (0x3e8), region = 48  ;;  %p274_p10 = scmp.lt.s32.totalorder (!%p242_p9), %s2322_s13, 3  ;;  %v2580_v44 = vmov (!%p242_p9), 2475754826   ;;  %v2581_v46 = vmov (!%p242_p9), 2131351028  }
   0xf   : > { %v2582_v48 = vmov (!%p242_p9), 2102212464   ;;  %v2583_v50 = vmov (!%p242_p9), 920167782   ;;  %v2584_v58 = vmov (!%p242_p9), 1326507024   ;;  %s3513_s16 = scalar_lea.hbm (!%p242_p9), %s3564_s7, %s2398_s8 }
  0x10   : > { %s2586_s19 = smov (!%p242_p9), [#allocation2]  }
  0x11   : > { %s2519_s20 = sshll.u32 (!%p242_p9), %s2586_s19, 4  ;;  %s2520_s20 = int_to_ptr.vmem [resolvable:$false] %s2519_s20 }
  0x12   : > { %s2521_s21 = scalar_lea.vmem (!%p242_p9), %s2520_s20, 256 }
  0x15   : > { %s3582_s13 = smov (!%p274_p10, %s2322_s13), 3 }
  0x16   : > { %s2323_s14 = sshll.u32 %s3582_s13, 3 }
  0x17   : > { %s2679_s17 = scalar_lea.vmem %s3557_s0, %s2323_s14 }
  0x18   : > { %v2682_v0 = vld [vmem:[%s2679_s17 + $0x8] sm:$0xff]  ;;  %v2685_v1 = vld [vmem:[%s2679_s17] sm:$0xff] }
  0x19   : > { %v284_v2 = vmul.f32 2.0, %v2682_v0  ;;  %v286_v3 = vmul.f32 4.0, %v2682_v0  ;;  %v2690_v4 = vmul.f32 8.0, %v2682_v0  ;;  %v2693_v5 = vmul.f32 4.0, %v2685_v1 }
  0x1a   : > { %v283_v8 = vmul.f32 2.0, %v2685_v1  ;;  %v2718_v23 = vmul.f32 8.0, %v2685_v1 }
  0x1b   : > { %v294_v6 = vrot.slane %v286_v3, 2  ;;  %v300_v7 = vrot.slane %v2690_v4, 4  ;;  %v293_v9 = vrot.slane %v2693_v5, 2 }
  0x1c   : > { %v299_v31 = vrot.slane %v2718_v23, 4 }
  0x1d   : > { %v2698_v10 = vsel %vm309_vm0, %v284_v2, %v294_v6  ;;  %v2703_v11 = vsel %vm312_vm1, %v294_v6, %v300_v7  ;;  %v2711_v17 = vsel %vm309_vm0, %v283_v8, %v293_v9 }
  0x1e   : > { %v422_v12 = vand.u32 2147483647, %v2698_v10  ;;  %v425_v13 = vand.u32 2139095040, %v2698_v10  ;;  %v630_v14 = vand.u32 2147483647, %v2703_v11  ;;  %v633_v15 = vand.u32 2139095040, %v2703_v11 }
  0x1f   : > { %v321_v24 = vand.u32 2139095040, %v2711_v17  ;;  %v318_v36 = vand.u32 2147483647, %v2711_v17  ;;  %vm424_vm15 = vcmp.lt.s32.totalorder %v2698_v10, 0  ;;  %vm632_vm0 = vcmp.lt.s32.totalorder %v2703_v11, 0 }
  0x20   : > { %v426_v16 = vshrl.u32 %v425_v13, 23  ;;  %v429_v18 = vand.u32 8388607, %v422_v12  ;;  %v634_v19 = vshrl.u32 %v633_v15, 23  ;;  %v637_v20 = vand.u32 8388607, %v630_v14 }
  0x21   : > { %v322_v29 = vshrl.u32 %v321_v24, 23 }
  0x22   : > { %v2328_v21 = vadd.s32 4294967169, %v426_v16  ;;  %v2336_v22 = vadd.s32 4294967169, %v634_v19  ;;  %v430_v26 = vor.u32 8388608, %v429_v18  ;;  %v638_v27 = vor.u32 8388608, %v637_v20 }
  0x23   : > { %v2324_v32 = vadd.s32 4294967169, %v322_v29 }
  0x24   : > { %v432_v25 = vadd.s32 1, %v2328_v21  ;;  %v640_v28 = vadd.s32 1, %v2336_v22  ;;  %v2723_v37 = vshll.u32 %v430_v26, 8  ;;  %v2727_v40 = vshll.u32 %v638_v27, 8 }
  0x25   : > { %v2734_v52 = vadd.s32 1, %v2324_v32 }
  0x26   : > { %vm433_vm2 = vcmp.gt.s32.totalorder %v432_v25, 0  ;;  %vm641_vm3 = vcmp.gt.s32.totalorder %v640_v28, 0 }
  0x27   : > { %v434_v30 = vsel %vm433_vm2, %v432_v25, 0  ;;  %v642_v35 = vsel %vm641_vm3, %v640_v28, 0  ;;  %vm329_vm13 = vcmp.gt.s32.totalorder %v2734_v52, 0 }
  0x28   : > { %v435_v33 = vshrl.u32 %v434_v30, 5  ;;  %v436_v34 = vand.u32 31, %v434_v30  ;;  %v2725_v38 = vshrl.u32 %v642_v35, 5  ;;  %v644_v39 = vand.u32 31, %v642_v35 }
  0x2a   : > { %v437_v41 = vsub.s32 32, %v436_v34  ;;  %v439_v43 = vshll.u32 %v2579_v42, %v436_v34  ;;  %v442_v45 = vshll.u32 %v2580_v44, %v436_v34  ;;  %v445_v47 = vshll.u32 %v2581_v46, %v436_v34 }
  0x2b   : > { %v448_v49 = vshll.u32 %v2582_v48, %v436_v34  ;;  %v451_v51 = vshll.u32 %v2583_v50, %v436_v34  ;;  %vm454_vm4 = vcmp.lt.s32.totalorder %v435_v33, 1  ;;  %vm455_vm5 = vcmp.lt.s32.totalorder %v435_v33, 2 }
  0x2c   : > { %v438_v53 = vshrl.u32 %v2579_v42, %v437_v41  ;;  %v440_v54 = vshrl.u32 %v2580_v44, %v437_v41  ;;  %v443_v55 = vshrl.u32 %v2581_v46, %v437_v41  ;;  %v446_v56 = vshrl.u32 %v2582_v48, %v437_v41 }
  0x2d   : > { %v449_v57 = vshrl.u32 %v2583_v50, %v437_v41  ;;  %v452_v59 = vshrl.u32 %v2584_v58, %v437_v41  ;;  %vm457_vm6 = vcmp.lt.s32.totalorder %v435_v33, 4  ;;  %v645_v63 = vsub.s32 32, %v644_v39 }
  0x2e   : > { %v441_v60 = vor.u32 %v440_v54, %v439_v43  ;;  %v444_v61 = vor.u32 %v443_v55, %v442_v45  ;;  %v447_v62 = vor.u32 %v446_v56, %v445_v47  ;;  %vm456_vm7 = vcmp.lt.s32.totalorder %v435_v33, 3 }
  0x2f   : > { %v450_v2 = vor.u32 %v449_v57, %v448_v49  ;;  %v453_v3 = vor.u32 %v452_v59, %v451_v51  ;;  %v647_v6 = vshll.u32 %v2579_v42, %v644_v39  ;;  %v650_v21 = vshll.u32 %v2580_v44, %v644_v39 }
  0x30   : > { %v458_v8 = vsel %vm454_vm4, %v438_v53, %v441_v60  ;;  %v459_v13 = vsel %vm457_vm6, %v447_v62, 2102212464  ;;  %v462_v15 = vsel %vm454_vm4, %v441_v60, %v444_v61  ;;  %v466_v16 = vsel %vm454_vm4, %v444_v61, %v447_v62 }
  0x31   : > { %v460_v18 = vsel %vm456_vm7, %v444_v61, %v459_v13  ;;  %v463_v19 = vsel %vm457_vm6, %v450_v2, 920167782  ;;  %v467_v20 = vsel %vm457_vm6, %v453_v3, 1326507024  ;;  %v646_v25 = vshrl.u32 %v2579_v42, %v645_v63 }
  0x32   : > { %v464_v22 = vsel %vm456_vm7, %v447_v62, %v463_v19  ;;  %v468_v24 = vsel %vm456_vm7, %v450_v2, %v467_v20  ;;  %v648_v26 = vshrl.u32 %v2580_v44, %v645_v63  ;;  %v461_v27 = vsel %vm455_vm5, %v458_v8, %v460_v18 }
  0x33   : > { %v465_v28 = vsel %vm455_vm5, %v462_v15, %v464_v22  ;;  %v469_v29 = vsel %vm455_vm5, %v466_v16, %v468_v24  ;;  %v651_v30 = vshrl.u32 %v2581_v46, %v645_v63  ;;  %v653_v47 = vshll.u32 %v2581_v46, %v644_v39 }
  0x34   : > { %v2754_v32 = vmul.u32.u64.low %v2723_v37, %v469_v29  ;;  %v2755_v34 = vmul.u32.u64.high %v2723_v37, %v469_v29, %v2754_v32  ;;  %v2758_v35 = vmul.u32.u64.low %v2723_v37, %v465_v28  ;;  %v2759_v41 = vmul.u32.u64.high %v2723_v37, %v465_v28, %v2758_v35 }
  0x35   : > { %v649_v43 = vor.u32 %v648_v26, %v647_v6  ;;  %v652_v45 = vor.u32 %v651_v30, %v650_v21  ;;  %v654_v49 = vshrl.u32 %v2582_v48, %v645_v63  ;;  %v656_v33 = vshll.u32 %v2582_v48, %v644_v39 }
  0x36   : > { %v657_v51 = vshrl.u32 %v2583_v50, %v645_v63  ;;  %v659_v53 = vshll.u32 %v2583_v50, %v644_v39  ;;  %v660_v54 = vshrl.u32 %v2584_v58, %v645_v63  ;;  %v477_v55 = vmul.u32 %v2723_v37, %v461_v27 }
  0x37   : > { %v655_v56 = vor.u32 %v654_v49, %v653_v47  ;;  %vm662_vm8 = vcmp.lt.s32.totalorder %v2725_v38, 1  ;;  %vm663_vm9 = vcmp.lt.s32.totalorder %v2725_v38, 2  ;;  %vm479_vm10 = vc.u32 %v2755_v34, %v2758_v35 }
  0x38   : > { %v480_v57 = vadd.s32 1, %v2759_v41  ;;  %v658_v59 = vor.u32 %v657_v51, %v656_v33  ;;  %vm664_vm11 = vcmp.lt.s32.totalorder %v2725_v38, 3  ;;  %v661_v60 = vor.u32 %v660_v54, %v659_v53 }
  0x39   : > { %vm665_vm12 = vcmp.lt.s32.totalorder %v2725_v38, 4  ;;  %v666_v39 = vsel %vm662_vm8, %v646_v25, %v649_v43  ;;  %v670_v61 = vsel %vm662_vm8, %v649_v43, %v652_v45  ;;  %v674_v2 = vsel %vm662_vm8, %v652_v45, %v655_v56 }
  0x3a   : > { %v481_v37 = vsel %vm479_vm10, %v480_v57, %v2759_v41  ;;  %v667_v62 = vsel %vm665_vm12, %v655_v56, 2102212464  ;;  %v671_v63 = vsel %vm665_vm12, %v658_v59, 920167782  ;;  %v675_v13 = vsel %vm665_vm12, %v661_v60, 1326507024 }
  0x3b   : > { %v482_v3 = vadd.s32 %v481_v37, %v477_v55  ;;  %v668_v6 = vsel %vm664_vm11, %v652_v45, %v667_v62  ;;  %v672_v8 = vsel %vm664_vm11, %v655_v56, %v671_v63  ;;  %v676_v18 = vsel %vm664_vm11, %v658_v59, %v675_v13 }
  0x3c   : > { %v669_v15 = vsel %vm663_vm9, %v666_v39, %v668_v6  ;;  %v673_v16 = vsel %vm663_vm9, %v670_v61, %v672_v8  ;;  %v677_v20 = vsel %vm663_vm9, %v674_v2, %v676_v18  ;;  %v330_v26 = vsel %vm329_vm13, %v2734_v52, 0 }
  0x3d   : > { %v483_v19 = vadd.s32 536870912, %v482_v3  ;;  %v2785_v21 = vmul.u32.u64.low %v2727_v40, %v673_v16  ;;  %v2786_v22 = vmul.u32.u64.high %v2727_v40, %v673_v16, %v2785_v21  ;;  %v332_v28 = vand.u32 31, %v330_v26 }
  0x3e   : > { %v2790_v24 = vmul.u32.u64.low %v2727_v40, %v677_v20  ;;  %v2791_v25 = vmul.u32.u64.high %v2727_v40, %v677_v20, %v2790_v24  ;;  %v2797_v29 = vmul.f32 16.0, %v2682_v0  ;;  %v685_v38 = vmul.u32 %v2727_v40, %v669_v15 }
  0x3f   : > { %v2794_v27 = vshrl.u32 %v483_v19, 30  ;;  %v325_v30 = vand.u32 8388607, %v318_v36  ;;  %v688_v41 = vadd.s32 1, %v2786_v22  ;;  %v2809_v52 = vsel %vm312_vm1, %v293_v9, %v299_v31 }
  0x40   : > { %vm687_vm14 = vc.u32 %v2791_v25, %v2785_v21  ;;  %v333_v43 = vsub.s32 32, %v332_v28  ;;  %v306_v47 = vrot.slane %v2797_v29, 6  ;;  %v526_v51 = vand.u32 2147483647, %v2809_v52 }
  0x41   : > { %v485_v32 = vshll.u32 %v2794_v27, 30  ;;  %v689_v40 = vsel %vm687_vm14, %v688_v41, %v2786_v22  ;;  %v326_v33 = vor.u32 8388608, %v325_v30  ;;  %v529_v53 = vand.u32 2139095040, %v2809_v52 }
  0x42   : > { %v690_v49 = vadd.s32 %v689_v40, %v685_v38  ;;  %v2820_v9 = vshrl.u32 %v330_v26, 5  ;;  %v335_v54 = vshll.u32 %v2579_v42, %v332_v28  ;;  %v338_v55 = vshll.u32 %v2580_v44, %v332_v28 }
  0x43   : > { %v2813_v45 = vsub.s32 %v482_v3, %v485_v32  ;;  %v336_v57 = vshrl.u32 %v2580_v44, %v333_v43  ;;  %v339_v59 = vshrl.u32 %v2581_v46, %v333_v43  ;;  %v341_v60 = vshll.u32 %v2581_v46, %v332_v28 }
  0x44   : > { %v691_v56 = vadd.s32 536870912, %v690_v49  ;;  %v342_v61 = vshrl.u32 %v2582_v48, %v333_v43  ;;  %v344_v37 = vshll.u32 %v2582_v48, %v332_v28  ;;  %v345_v62 = vshrl.u32 %v2583_v50, %v333_v43 }
  0x45   : > { %v488_v5 = vsub.s32 0, %v2813_v45  ;;  %v347_v2 = vshll.u32 %v2583_v50, %v332_v28  ;;  %v348_v3 = vshrl.u32 %v2584_v58, %v333_v43  ;;  %v2833_v6 = vshll.u32 %v326_v33, 8 }
  0x46   : > { %v692_v63 = vshrl.u32 %v691_v56, 30  ;;  %v478_v8 = vadd.s32 %v2758_v35, %v2755_v34  ;;  %v508_v15 = vsub.s32 4, %v2794_v27  ;;  %v530_v16 = vshrl.u32 %v529_v53, 23 }
  0x47   : > { %v2329_v39 = vmin.u32 %v488_v5, %v2813_v45  ;;  %v334_v19 = vshrl.u32 %v2579_v42, %v333_v43  ;;  %v337_v20 = vor.u32 %v336_v57, %v335_v54  ;;  %v340_v22 = vor.u32 %v339_v59, %v338_v55 }
  0x48   : > { %v693_v18 = vshll.u32 %v692_v63, 30  ;;  %v343_v26 = vor.u32 %v342_v61, %v341_v60  ;;  %v346_v28 = vor.u32 %v345_v62, %v344_v37  ;;  %vm350_vm2 = vcmp.lt.s32.totalorder %v2820_v9, 1 }
  0x49   : > { %v490_v13 = vclz %v2329_v39  ;;  %v716_v30 = vsub.s32 4, %v692_v63  ;;  %v349_v34 = vor.u32 %v348_v3, %v347_v2  ;;  %vm353_vm3 = vcmp.lt.s32.totalorder %v2820_v9, 4 }
  0x4a   : > { %v2842_v38 = vsub.s32 %v690_v49, %v693_v18  ;;  %vm2847_vm4 = vcmp.le.f32.partialorder %v422_v12, 0.7853982  ;;  %vm351_vm6 = vcmp.lt.s32.totalorder %v2820_v9, 2  ;;  %vm352_vm7 = vcmp.lt.s32.totalorder %v2820_v9, 3 }
  0x4b   : > { %v2330_v24 = vadd.s32 4294967294, %v490_v13  ;;  %v355_v32 = vsel %vm353_vm3, %v343_v26, 2102212464  ;;  %vm2857_vm8 = vcmp.le.f32.partialorder %v630_v14, 0.7853982  ;;  %v354_v40 = vsel %vm350_vm2, %v334_v19, %v337_v20 }
  0x4c   : > { %v696_v12 = vsub.s32 0, %v2842_v38  ;;  %v358_v49 = vsel %vm350_vm2, %v337_v20, %v340_v22  ;;  %v359_v54 = vsel %vm353_vm3, %v346_v28, 920167782  ;;  %v356_v55 = vsel %vm352_vm7, %v340_v22, %v355_v32 }
  0x4d   : > { %vm2331_vm5 = vcmp.lt.s32.totalorder %v2330_v24, 0  ;;  %v360_v56 = vsel %vm352_vm7, %v343_v26, %v359_v54  ;;  %v362_v57 = vsel %vm350_vm2, %v340_v22, %v343_v26  ;;  %v363_v39 = vsel %vm353_vm3, %v349_v34, 1326507024 }
  0x4e   : > { %v493_v41 = vsel %vm2331_vm5, 0, %v2330_v24  ;;  %v2337_v14 = vmin.u32 %v696_v12, %v2842_v38  ;;  %v509_v61 = vsel %vm424_vm15, %v508_v15, %v2794_v27  ;;  %v717_v62 = vsel %vm632_vm0, %v716_v30, %v692_v63 }
  0x4f   : > { %v494_v33 = vsub.s32 32, %v493_v41  ;;  %v495_v53 = vshll.u32 %v2813_v45, %v493_v41  ;;  %v498_v5 = vsub.s32 4294967266, %v493_v41  ;;  %v361_v45 = vsel %vm351_vm6, %v358_v49, %v360_v56 }
  0x50   : > { %v698_v37 = vclz %v2337_v14  ;;  %v2332_v2 = vadd.s32 4294967169, %v530_v16  ;;  %vm315_vm9 = vcmask 1041408   ;;  %v364_v18 = vsel %vm352_vm7, %v346_v28, %v363_v39 }
  0x51   : > { %v496_v59 = vshrl.u32 %v478_v8, %v494_v33  ;;  %v499_v60 = vadd.s32 127, %v498_v5  ;;  %v357_v8 = vsel %vm351_vm6, %v354_v40, %v356_v55  ;;  %v365_v20 = vsel %vm351_vm6, %v362_v57, %v364_v18 }
  0x52   : > { %v2338_v19 = vadd.s32 4294967294, %v698_v37  ;;  %v2892_v27 = vmul.u32.u64.low %v2833_v6, %v361_v45  ;;  %v2893_v15 = vmul.u32.u64.high %v2833_v6, %v361_v45, %v2892_v27  ;;  %v2902_v26 = vsel %vm2847_vm4, 0, %v509_v61 }
  0x53   : > { %v497_v3 = vor.u32 %v496_v59, %v495_v53  ;;  %v500_v13 = vshll.u32 %v499_v60, 23  ;;  %v2897_v22 = vmul.u32.u64.low %v2833_v6, %v365_v20  ;;  %v2898_v24 = vmul.u32.u64.high %v2833_v6, %v365_v20, %v2897_v22 }
  0x54   : > { %v686_v28 = vadd.s32 %v2785_v21, %v2791_v25  ;;  %vm2339_vm10 = vcmp.lt.s32.totalorder %v2338_v19, 0  ;;  %v536_v9 = vadd.s32 1, %v2332_v2  ;;  %v2908_v32 = vsel %vm2857_vm8, 0, %v717_v62 }
  0x55   : > { %v501_v63 = vor.u32 4788187, %v500_v13  ;;  %v504_v16 = vcvt.s32.f32 %v497_v3  ;;  %v701_v34 = vsel %vm2339_vm10, 0, %v2338_v19  ;;  %v373_v41 = vmul.u32 %v2833_v6, %v357_v8 }
  0x56   : > { %v702_v12 = vsub.s32 32, %v701_v34  ;;  %v703_v40 = vshll.u32 %v2842_v38, %v701_v34  ;;  %v706_v49 = vsub.s32 4294967266, %v701_v34  ;;  %v376_v33 = vadd.s32 1, %v2893_v15 }
  0x57   : > { %v502_v30 = vand.u32 2147483647, %v501_v63  ;;  %v515_v5 = vadd.s32 3, %v2902_v26  ;;  %vm375_vm11 = vc.u32 %v2898_v24, %v2892_v27  ;;  %vm537_vm12 = vcmp.gt.s32.totalorder %v536_v9, 0 }
  0x58   : > { %v704_v21 = vshrl.u32 %v686_v28, %v702_v12  ;;  %v707_v25 = vadd.s32 127, %v706_v49  ;;  %v377_v54 = vsel %vm375_vm11, %v376_v33, %v2893_v15  ;;  %v538_v14 = vsel %vm537_vm12, %v536_v9, 0 }
  0x59   : > { %v505_v53 = vmul.f32 %v504_v16, %v502_v30  ;;  %v723_v6 = vadd.s32 3, %v2908_v32  ;;  %v378_v56 = vadd.s32 %v377_v54, %v373_v41  ;;  %v540_v38 = vand.u32 31, %v538_v14 }
  0x5a   : > { %v705_v57 = vor.u32 %v704_v21, %v703_v40  ;;  %v708_v59 = vshll.u32 %v707_v25, 23  ;;  %v2920_v60 = vand.u32 8388607, %v526_v51  ;;  %v2923_v45 = vmul.f32 16.0, %v2685_v1 }
  0x5b   : > { %v506_v55 = vxor.u32 2147483648, %v505_v53  ;;  %v379_v61 = vadd.s32 536870912, %v378_v56  ;;  %v541_v37 = vsub.s32 32, %v540_v38  ;;  %v2932_v62 = vsel %vm315_vm9, %v300_v7, %v306_v47 }
  0x5c   : > { %v2937_v3 = vand.u32 3, %v515_v5  ;;  %v709_v13 = vor.u32 4788187, %v708_v59  ;;  %v712_v8 = vcvt.s32.f32 %v705_v57  ;;  %v2939_v18 = vand.u32 3, %v723_v6 }
  0x5d   : > { %v507_v39 = vsel %vm424_vm15, %v506_v55, %v505_v53  ;;  %v380_v19 = vshrl.u32 %v379_v61, 30  ;;  %v2941_v20 = vshrl.u32 %v538_v14, 5  ;;  %vm320_vm13 = vcmp.lt.s32.totalorder %v2711_v17, 0 }
  0x5e   : > { %v510_v2 = vsel %vm2847_vm4, %v2698_v10, %v507_v39  ;;  %v710_v29 = vand.u32 2147483647, %v709_v13  ;;  %v543_v4 = vshll.u32 %v2579_v42, %v540_v38  ;;  %v546_v7 = vshll.u32 %v2580_v44, %v540_v38 }
  0x5f   : > { %2489 = vcosq.f32 %v510_v2  ;;  %v381_v47 = vshll.u32 %v380_v19, 30  ;;  %v544_v35 = vshrl.u32 %v2580_v44, %v541_v37  ;;  %v547_v15 = vshrl.u32 %v2581_v46, %v541_v37 }
  0x60   : > { %2491 = vsinq.f32 %v510_v2  ;;  %v549_v63 = vshll.u32 %v2581_v46, %v540_v38  ;;  %v713_v16 = vmul.f32 %v712_v8, %v710_v29  ;;  %v550_v22 = vshrl.u32 %v2582_v48, %v541_v37 }
  0x61   : > { %v552_v28 = vshll.u32 %v2582_v48, %v540_v38  ;;  %v553_v9 = vshrl.u32 %v2583_v50, %v541_v37  ;;  %vm521_vm14 = vcmp.eq.s32.totalorder %v2937_v3, 2  ;;  %vm2955_vm15 = vcmp.le.f32.partialorder %v318_v36, 0.7853982 }
  0x62   : > { %v2959_v34 = vsub.s32 %v378_v56, %v381_v47  ;;  %v534_v41 = vor.u32 8388608, %v2920_v60  ;;  %v838_v12 = vand.u32 2147483647, %v2932_v62  ;;  %v841_v40 = vand.u32 2139095040, %v2932_v62 }
  0x63   : > { %vm518_vm2 = vcmp.eq.s32.totalorder %v2937_v3, 0  ;;  %v714_v49 = vxor.u32 2147483648, %v713_v16  ;;  %v554_v33 = vor.u32 %v553_v9, %v552_v28  ;;  %v555_v53 = vshll.u32 %v2583_v50, %v540_v38 }
  0x64   : > { %v556_v5 = vshrl.u32 %v2584_v58, %v541_v37  ;;  %v384_v36 = vsub.s32 0, %v2959_v34  ;;  %v404_v21 = vsub.s32 4, %v380_v19  ;;  %v542_v25 = vshrl.u32 %v2579_v42, %v541_v37 }
  0x65   : > { %v545_v54 = vor.u32 %v544_v35, %v543_v4  ;;  %v715_v14 = vsel %vm632_vm0, %v714_v49, %v713_v16  ;;  %v548_v55 = vor.u32 %v547_v15, %v546_v7  ;;  %v551_v6 = vor.u32 %v550_v22, %v549_v63 }
  0x66   : > { %vm561_vm3 = vcmp.lt.s32.totalorder %v2941_v20, 4  ;;  %vm517_vm4 = vcmp.lt.s32.totalorder %v2937_v3, 2  ;;  %v718_v56 = vsel %vm2857_vm8, %v2703_v11, %v715_v14  ;;  %v2325_v38 = vmin.u32 %v384_v36, %v2959_v34 }
  0x67   : > { %vm558_vm5 = vcmp.lt.s32.totalorder %v2941_v20, 1  ;;  %vm560_vm6 = vcmp.lt.s32.totalorder %v2941_v20, 3  ;;  %2493 = vcosq.f32 %v718_v56  ;;  %v557_v57 = vor.u32 %v556_v5, %v555_v53 }
  0x68   : > { %v563_v59 = vsel %vm561_vm3, %v551_v6, 2102212464  ;;  %v567_v60 = vsel %vm561_vm3, %v554_v33, 920167782  ;;  %2495 = vsinq.f32 %v718_v56  ;;  %v374_v43 = vadd.s32 %v2892_v27, %v2898_v24 }
  0x69   : > { %v2983_v39 = vpop.eup %2489  ;;  %v386_v61 = vclz %v2325_v38  ;;  %v405_v37 = vsel %vm320_vm13, %v404_v21, %v380_v19  ;;  %vm559_vm0 = vcmp.lt.s32.totalorder %v2941_v20, 2  ;;  %v566_v8 = vsel %vm558_vm5, %v545_v54, %v548_v55 }
  0x6a   : > { %v2989_v2 = vpop.eup %2491  ;;  %v522_v13 = vxor.u32 2147483648, %v2983_v39  ;;  %v568_v29 = vsel %vm560_vm6, %v551_v6, %v567_v60  ;;  %vm514_vm7 = vweird.f32 %v2698_v10  ;;  %v562_v19 = vsel %vm558_vm5, %v542_v25, %v545_v54 }
  0x6b   : > { %v519_v27 = vxor.u32 2147483648, %v2989_v2  ;;  %v2326_v24 = vadd.s32 4294967294, %v386_v61  ;;  %v564_v4 = vsel %vm560_vm6, %v548_v55, %v563_v59  ;;  %vm725_vm8 = vcmp.lt.s32.totalorder %v2939_v18, 2 }
  0x6c   : > { %v3006_v7 = vsel %vm2955_vm15, 0, %v405_v37  ;;  %v570_v47 = vsel %vm558_vm5, %v548_v55, %v551_v6  ;;  %v571_v35 = vsel %vm561_vm3, %v557_v57, 1326507024  ;;  %v574_v15 = vshll.u32 %v534_v41, 8 }
  0x6d   : > { %vm722_vm10 = vweird.f32 %v2703_v11  ;;  %vm2327_vm11 = vcmp.lt.s32.totalorder %v2326_v24, 0  ;;  %v569_v63 = vsel %vm559_vm0, %v566_v8, %v568_v29  ;;  %v572_v16 = vsel %vm560_vm6, %v554_v33, %v571_v35 }
  0x6e   : > { %v842_v22 = vshrl.u32 %v841_v40, 23  ;;  %v523_v28 = vsel %vm521_vm14, %v522_v13, %v2989_v2  ;;  %v389_v9 = vsel %vm2327_vm11, 0, %v2326_v24  ;;  %v565_v41 = vsel %vm559_vm0, %v562_v19, %v564_v4 }
  0x6f   : > { %v573_v49 = vsel %vm559_vm0, %v570_v47, %v572_v16  ;;  %v520_v33 = vsel %vm518_vm2, %v2983_v39, %v519_v27  ;;  %v390_v40 = vsub.s32 32, %v389_v9  ;;  %v391_v53 = vshll.u32 %v2959_v34, %v389_v9 }
  0x70   : > { %v394_v5 = vsub.s32 4294967266, %v389_v9  ;;  %v3032_v36 = vmul.u32.u64.low %v574_v15, %v573_v49  ;;  %v3033_v21 = vmul.u32.u64.high %v574_v15, %v573_v49, %v3032_v36  ;;  %vm726_vm12 = vcmp.eq.s32.totalorder %v2939_v18, 0 }
  0x71   : > { %v3035_v25 = vmul.u32.u64.low %v574_v15, %v569_v63  ;;  %v3036_v54 = vmul.u32.u64.high %v574_v15, %v569_v63, %v3035_v25  ;;  %v392_v20 = vshrl.u32 %v374_v43, %v390_v40  ;;  %v2344_v55 = vadd.s32 4294967169, %v842_v22  ;;  %v3040_v6 = vpop.eup %2493 }
  0x72   : > { %v395_v14 = vadd.s32 127, %v394_v5  ;;  %v524_v56 = vsel %vm517_vm4, %v520_v33, %v523_v28  ;;  %vm729_vm14 = vcmp.eq.s32.totalorder %v2939_v18, 2  ;;  %v411_v34 = vadd.s32 3, %v3006_v7  ;;  %v3046_v57 = vpop.eup %2495 }
  0x73   : > { %v581_v38 = vmul.u32 %v574_v15, %v565_v41  ;;  %v730_v59 = vxor.u32 2147483648, %v3040_v6  ;;  %v393_v60 = vor.u32 %v392_v20, %v391_v53  ;;  %v848_v37 = vadd.s32 1, %v2344_v55 }
  0x74   : > { %v396_v61 = vshll.u32 %v395_v14, 23  ;;  %v727_v43 = vxor.u32 2147483648, %v3046_v57  ;;  %vm583_vm2 = vc.u32 %v3033_v21, %v3035_v25  ;;  %v584_v3 = vadd.s32 1, %v3036_v54 }
  0x75   : > { %v845_v8 = vand.u32 8388607, %v838_v12  ;;  %v731_v29 = vsel %vm729_vm14, %v730_v59, %v3046_v57  ;;  %v400_v19 = vcvt.s32.f32 %v393_v60  ;;  %vm849_vm3 = vcmp.gt.s32.totalorder %v848_v37, 0 }
  0x76   : > { %v397_v24 = vor.u32 4788187, %v396_v61  ;;  %v525_v4 = vsel %vm514_vm7, nan, %v524_v56  ;;  %v728_v47 = vsel %vm726_vm12, %v3040_v6, %v727_v43  ;;  %v585_v35 = vsel %vm583_vm2, %v584_v3, %v3036_v54 }
  0x77   : > { %v850_v15 = vsel %vm849_vm3, %v848_v37, 0  ;;  %v732_v63 = vsel %vm725_vm8, %v728_v47, %v731_v29  ;;  %v586_v22 = vadd.s32 %v585_v35, %v581_v38  ;;  %v1561_v9 = vpack.c.bf16 %v2682_v0, %v2682_v0 }
  0x78   : > { %v398_v16 = vand.u32 2147483647, %v397_v24  ;;  %v733_v28 = vsel %vm722_vm10, nan, %v732_v63  ;;  %v852_v41 = vand.u32 31, %v850_v15  ;;  %v305_v49 = vrot.slane %v2923_v45, 6 }
  0x79   : > { %v1563_v33 = vpack.c.bf16 %v733_v28, %v525_v4  ;;  %v3073_v53 = vand.u32 3, %v411_v34  ;;  %v587_v5 = vadd.s32 536870912, %v586_v22  ;;  %v846_v36 = vor.u32 8388608, %v845_v8 }
  0x7a   : > { %v401_v40 = vmul.f32 %v400_v19, %v398_v16  ;;  %v851_v54 = vshrl.u32 %v850_v15, 5  ;;  %v853_v18 = vsub.s32 32, %v852_v41  ;;  %v855_v20 = vshll.u32 %v2579_v42, %v852_v41 }
  0x7b   : > { %v3076_v14 = vrot.slane %v1563_v33, 4  ;;  %v588_v56 = vshrl.u32 %v587_v5, 30  ;;  %v858_v38 = vshll.u32 %v2580_v44, %v852_v41  ;;  %v861_v60 = vshll.u32 %v2581_v46, %v852_v41 }
  0x7c   : > { %v402_v55 = vxor.u32 2147483648, %v401_v40  ;;  %v856_v0 = vshrl.u32 %v2580_v44, %v853_v18  ;;  %v859_v45 = vshrl.u32 %v2581_v46, %v853_v18  ;;  %v862_v34 = vshrl.u32 %v2582_v48, %v853_v18 }
  0x7d   : > { %v1589_v61 = vsel %vm312_vm1, %v1561_v9, %v3076_v14  ;;  %vm528_vm4 = vcmp.lt.s32.totalorder %v2809_v52, 0  ;;  %v589_v3 = vshll.u32 %v588_v56, 30  ;;  %v864_v8 = vshll.u32 %v2582_v48, %v852_v41 }
  0x7e   : > { %v403_v37 = vsel %vm320_vm13, %v402_v55, %v401_v40  ;;  %1686 = vmatprep.subr.bf16.mxu0 %v1589_v61  ;;  %v854_v24 = vshrl.u32 %v2579_v42, %v853_v18  ;;  %v857_v19 = vor.u32 %v856_v0, %v855_v20  ;;  %vm870_vm5 = vcmp.lt.s32.totalorder %v851_v54, 1 }
  0x7f   : > { %v406_v29 = vsel %vm2955_vm15, %v2711_v17, %v403_v37  ;;  %v3093_v4 = vsub.s32 %v586_v22, %v589_v3  ;;  %v860_v47 = vor.u32 %v859_v45, %v858_v38  ;;  %v865_v35 = vshrl.u32 %v2583_v50, %v853_v18 }
  0x80   : > { %2497 = vcosq.f32 %v406_v29  ;;  %v863_v15 = vor.u32 %v862_v34, %v861_v60  ;;  %v867_v63 = vshll.u32 %v2583_v50, %v852_v41  ;;  %v868_v16 = vshrl.u32 %v2584_v58, %v853_v18 }
  0x81   : > { %2499 = vsinq.f32 %v406_v29  ;;  %vm3100_vm13 = vcmp.le.f32.partialorder %v526_v51, 0.7853982  ;;  %v592_v28 = vsub.s32 0, %v3093_v4  ;;  %v612_v9 = vsub.s32 4, %v588_v56 }
  0x82   : > { %v866_v22 = vor.u32 %v865_v35, %v864_v8  ;;  %v886_v33 = vshll.u32 %v846_v36, 8  ;;  %v869_v40 = vor.u32 %v868_v16, %v867_v63  ;;  %vm871_vm15 = vcmp.lt.s32.totalorder %v851_v54, 2 }
  0x83   : > { %vm872_vm6 = vcmp.lt.s32.totalorder %v851_v54, 3  ;;  %vm873_vm0 = vcmp.lt.s32.totalorder %v851_v54, 4  ;;  %v2333_v5 = vmin.u32 %v592_v28, %v3093_v4  ;;  %v874_v41 = vsel %vm870_vm5, %v854_v24, %v857_v19 }
  0x84   : > { %v875_v18 = vsel %vm873_vm0, %v863_v15, 2102212464  ;;  %v878_v20 = vsel %vm870_vm5, %v857_v19, %v860_v47  ;;  %v879_v55 = vsel %vm873_vm0, %v866_v22, 920167782  ;;  %v882_v38 = vsel %vm870_vm5, %v860_v47, %v863_v15 }
  0x85   : > { %v876_v51 = vsel %vm872_vm6, %v860_v47, %v875_v18  ;;  %v883_v0 = vsel %vm873_vm0, %v869_v40, 1326507024  ;;  %vm414_vm8 = vcmp.eq.s32.totalorder %v3073_v53, 0  ;;  %vm417_vm11 = vcmp.eq.s32.totalorder %v3073_v53, 2 }
  0x86   : > { %v594_v36 = vclz %v2333_v5  ;;  %v3115_v45 = vsel %vm315_vm9, %v299_v31, %v305_v49  ;;  %v613_v60 = vsel %vm528_vm4, %v612_v9, %v588_v56  ;;  %v880_v34 = vsel %vm872_vm6, %v863_v15, %v879_v55 }
  0x87   : > { %v884_v61 = vsel %vm872_vm6, %v866_v22, %v883_v0  ;;  %v1138_v37 = vand.u32 3, %v2902_v26  ;;  %v877_v8 = vsel %vm871_vm15, %v874_v41, %v876_v51  ;;  %v881_v29 = vsel %vm871_vm15, %v878_v20, %v880_v34 }
  0x88   : > { %v2334_v3 = vadd.s32 4294967294, %v594_v36  ;;  %v885_v24 = vsel %vm871_vm15, %v882_v38, %v884_v61  ;;  %v3128_v31 = vmul.u32.u64.low %v886_v33, %v881_v29  ;;  %v3129_v49 = vmul.u32.u64.high %v886_v33, %v881_v29, %v3128_v31 }
  0x89   : > { %v3125_v23 = vmul.u32.u64.low %v886_v33, %v885_v24  ;;  %v3126_v19 = vmul.u32.u64.high %v886_v33, %v885_v24, %v3125_v23  ;;  %v582_v47 = vadd.s32 %v3035_v25, %v3033_v21  ;;  %v734_v26 = vand.u32 2147483647, %v3115_v45 }
  0x8a   : > { %v3132_v56 = vpop.eup %2497  ;;  %vm2335_vm12 = vcmp.lt.s32.totalorder %v2334_v3, 0  ;;  %v737_v35 = vand.u32 2139095040, %v3115_v45  ;;  %vm413_vm14 = vcmp.lt.s32.totalorder %v3073_v53, 2  ;;  %v3144_v16 = vsel %vm3100_vm13, 0, %v613_v60 }
  0x8b   : > { %v3138_v15 = vpop.eup %2499  ;;  %v418_v54 = vxor.u32 2147483648, %v3132_v56  ;;  %v597_v63 = vsel %vm2335_vm12, 0, %v2334_v3  ;;  %v893_v28 = vmul.u32 %v886_v33, %v877_v8  ;;  %vm1140_vm2 = vcmp.eq.s32.totalorder %v1138_v37, 0 }
  0x8c   : > { %v598_v9 = vsub.s32 32, %v597_v63  ;;  %v599_v21 = vshll.u32 %v3093_v4, %v597_v63  ;;  %v602_v25 = vsub.s32 4294967266, %v597_v63  ;;  %v415_v22 = vxor.u32 2147483648, %v3138_v15 }
  0x8d   : > { %vm895_vm3 = vc.u32 %v3126_v19, %v3128_v31  ;;  %v896_v40 = vadd.s32 1, %v3129_v49  ;;  %v1344_v5 = vand.u32 3, %v2908_v32  ;;  %v619_v20 = vadd.s32 3, %v3144_v16 }
  0x8e   : > { %v600_v41 = vshrl.u32 %v582_v47, %v598_v9  ;;  %v603_v18 = vadd.s32 127, %v602_v25  ;;  %v738_v51 = vshrl.u32 %v737_v35, 23  ;;  %v741_v4 = vand.u32 8388607, %v734_v26 }
  0x8f   : > { %v897_v33 = vsel %vm895_vm3, %v896_v40, %v3129_v49  ;;  %vm1139_vm5 = vcmp.lt.s32.totalorder %v1138_v37, 2  ;;  %v1142_v55 = vsel %vm1140_vm2, %v2983_v39, %v519_v27  ;;  %v419_v32 = vsel %vm417_vm11, %v418_v54, %v3138_v15 }
  0x90   : > { %v601_v38 = vor.u32 %v600_v41, %v599_v21  ;;  %v604_v0 = vshll.u32 %v603_v18, 23  ;;  %v898_v36 = vadd.s32 %v897_v33, %v893_v28  ;;  %v416_v60 = vsel %vm414_vm8, %v3132_v56, %v415_v22 }
  0x91   : > { %v2340_v34 = vadd.s32 4294967169, %v738_v51  ;;  %vm1143_vm15 = vcmp.eq.s32.totalorder %v1138_v37, 2  ;;  %vm1345_vm6 = vcmp.lt.s32.totalorder %v1344_v5, 2  ;;  %vm1346_vm0 = vcmp.eq.s32.totalorder %v1344_v5, 0 }
  0x92   : > { %v605_v61 = vor.u32 4788187, %v604_v0  ;;  %v608_v27 = vcvt.s32.f32 %v601_v38  ;;  %v899_v3 = vadd.s32 536870912, %v898_v36  ;;  %v1145_v8 = vsel %vm1143_vm15, %v522_v13, %v2989_v2 }
  0x93   : > { %v744_v29 = vadd.s32 1, %v2340_v34  ;;  %v1146_v24 = vsel %vm1139_vm5, %v1142_v55, %v1145_v8  ;;  %vm1349_vm11 = vcmp.eq.s32.totalorder %v1344_v5, 2  ;;  %v1348_v37 = vsel %vm1346_vm0, %v3040_v6, %v727_v43 }
  0x94   : > { %v606_v23 = vand.u32 2147483647, %v605_v61  ;;  %v3172_v49 = vshrl.u32 %v899_v3, 30  ;;  %v3176_v47 = vsel %vm514_vm7, nan, %v1146_v24  ;;  %vm410_vm8 = vweird.f32 %v2711_v17 }
  0x95   : > { %v742_v35 = vor.u32 8388608, %v741_v4  ;;  %vm745_vm12 = vcmp.gt.s32.totalorder %v744_v29, 0  ;;  %v1351_v39 = vsel %vm1349_vm11, %v730_v59, %v3046_v57  ;;  %v420_v2 = vsel %vm413_vm14, %v416_v60, %v419_v32 }
  0x96   : > { %v609_v13 = vmul.f32 %v608_v27, %v606_v23  ;;  %v901_v10 = vshll.u32 %v3172_v49, 30  ;;  %v746_v63 = vsel %vm745_vm12, %v744_v29, 0  ;;  %v1560_v28 = vpack.c.bf16 %v2685_v1, %v2685_v1 }
  0x97   : > { %v748_v9 = vand.u32 31, %v746_v63  ;;  %v1352_v43 = vsel %vm1345_vm6, %v1348_v37, %v1351_v39  ;;  %v3191_v25 = vand.u32 3, %v619_v20  ;;  %v3201_v57 = vsel %vm410_vm8, nan, %v420_v2 }
  0x98   : > { %v610_v21 = vxor.u32 2147483648, %v609_v13  ;;  %v3193_v40 = vsub.s32 %v898_v36, %v901_v10  ;;  %v3197_v6 = vsel %vm722_vm10, nan, %v1352_v43  ;;  %v894_v59 = vadd.s32 %v3128_v31, %v3126_v19 }
  0x99   : > { %v749_v53 = vsub.s32 32, %v748_v9  ;;  %v3205_v41 = vshll.u32 %v742_v35, 8  ;;  %v751_v20 = vshll.u32 %v2579_v42, %v748_v9  ;;  %v754_v11 = vshll.u32 %v2580_v44, %v748_v9 }
  0x9a   : > { %v611_v5 = vsel %vm528_vm4, %v610_v21, %v609_v13  ;;  %v904_v18 = vsub.s32 0, %v3193_v40  ;;  %v757_v31 = vshll.u32 %v2581_v46, %v748_v9  ;;  %v747_v55 = vshrl.u32 %v746_v63, 5 }
  0x9b   : > { %v614_v51 = vsel %vm3100_vm13, %v2809_v52, %v611_v5  ;;  %v752_v33 = vshrl.u32 %v2580_v44, %v749_v53  ;;  %v755_v19 = vshrl.u32 %v2581_v46, %v749_v53  ;;  %v758_v32 = vshrl.u32 %v2582_v48, %v749_v53 }
  0x9c   : > { %2501 = vcosq.f32 %v614_v51  ;;  %v2345_v4 = vmin.u32 %v904_v18, %v3193_v40  ;;  %v750_v38 = vshrl.u32 %v2579_v42, %v749_v53  ;;  %v760_v0 = vshll.u32 %v2582_v48, %v748_v9 }
  0x9d   : > { %2503 = vsinq.f32 %v614_v51  ;;  %v3223_v30 = vand.u32 3, %v3006_v7  ;;  %vm625_vm7 = vcmp.eq.s32.totalorder %v3191_v25, 2  ;;  %v753_v36 = vor.u32 %v752_v33, %v751_v20 }
  0x9e   : > { %v906_v44 = vclz %v2345_v4  ;;  %v756_v60 = vor.u32 %v755_v19, %v754_v11  ;;  %v3227_v46 = vand.u32 3, %v3144_v16  ;;  %vm622_vm10 = vcmp.eq.s32.totalorder %v3191_v25, 0 }
  0x9f   : > { %v759_v34 = vor.u32 %v758_v32, %v757_v31  ;;  %v761_v61 = vshrl.u32 %v2583_v50, %v749_v53  ;;  %v763_v42 = vshll.u32 %v2583_v50, %v748_v9  ;;  %v764_v48 = vshrl.u32 %v2584_v58, %v749_v53 }
  0xa0   : > { %vm621_vm4 = vcmp.lt.s32.totalorder %v3191_v25, 2  ;;  %v2346_v7 = vadd.s32 4294967294, %v906_v44  ;;  %vm766_vm13 = vcmp.lt.s32.totalorder %v747_v55, 1  ;;  %vm767_vm14 = vcmp.lt.s32.totalorder %v747_v55, 2 }
  0xa1   : > { %vm768_vm2 = vcmp.lt.s32.totalorder %v747_v55, 3  ;;  %vm618_vm3 = vweird.f32 %v2809_v52  ;;  %v762_v27 = vor.u32 %v761_v61, %v760_v0  ;;  %v765_v16 = vor.u32 %v764_v48, %v763_v42 }
  0xa2   : > { %vm769_vm5 = vcmp.lt.s32.totalorder %v747_v55, 4  ;;  %v770_v3 = vsel %vm766_vm13, %v750_v38, %v753_v36  ;;  %vm2347_vm15 = vcmp.lt.s32.totalorder %v2346_v7, 0  ;;  %v774_v29 = vsel %vm766_vm13, %v753_v36, %v756_v60 }
  0xa3   : > { %v771_v8 = vsel %vm769_vm5, %v759_v34, 2102212464  ;;  %v778_v24 = vsel %vm766_vm13, %v756_v60, %v759_v34  ;;  %v909_v23 = vsel %vm2347_vm15, 0, %v2346_v7  ;;  %v775_v58 = vsel %vm769_vm5, %v762_v27, 920167782  ;;  %v1599_v7 = vld [vmem:[%s3559_s2] sm:$0xff] }
  0xa4   : > { %v772_v50 = vsel %vm768_vm2, %v756_v60, %v771_v8  ;;  %v779_v37 = vsel %vm769_vm5, %v765_v16, 1326507024  ;;  %v910_v35 = vsub.s32 32, %v909_v23  ;;  %v911_v39 = vshll.u32 %v3193_v40, %v909_v23 }
  0xa5   : > { %v914_v2 = vsub.s32 4294967266, %v909_v23  ;;  %vm1036_vm6 = vcmp.lt.s32.totalorder %v3223_v30, 2  ;;  %v773_v13 = vsel %vm767_vm14, %v770_v3, %v772_v50  ;;  %v776_v10 = vsel %vm768_vm2, %v759_v34, %v775_v58  ;;  %v1600_v58 = vld [vmem:[%s3559_s2 + $0x8] sm:$0xff] }
  0xa6   : > { %v780_v63 = vsel %vm768_vm2, %v762_v27, %v779_v37  ;;  %v1567_v9 = vpack.c.bf16 %v3197_v6, %v3176_v47  ;;  %v2502_v43 = vpop.eup %2501  ;;  %v912_v21 = vshrl.u32 %v894_v59, %v910_v35  ;;  %v777_v5 = vsel %vm767_vm14, %v774_v29, %v776_v10  ;;  %v1602_v37 = vld [vmem:[%s3559_s2 + $0x18] sm:$0xff]  ;;  %v1604_v10 = vld [vmem:[%s3559_s2 + $0x28] sm:$0xff]  ;;  %v2481_v6 = vld [vmem:[%s3558_s1 + $0x10] sm:$0xff]  }
  0xa7   : > { %v915_v53 = vadd.s32 127, %v914_v2  ;;  %v781_v18 = vsel %vm767_vm14, %v778_v24, %v780_v63  ;;  %v2504_v40 = vpop.eup %2503  ;;  %v626_v20 = vxor.u32 2147483648, %v2502_v43  ;;  %vm840_vm0 = vcmp.lt.s32.totalorder %v2932_v62, 0  ;;  %v2480_v47 = vld [vmem:[%s3558_s1 + $0x8] sm:$0xff]  }
  0xa8   : > { %v3247_v11 = vmul.u32.u64.low %v3205_v41, %v781_v18  ;;  %v3248_v51 = vmul.u32.u64.high %v3205_v41, %v781_v18, %v3247_v11  ;;  %vm1037_vm11 = vcmp.eq.s32.totalorder %v3223_v30, 0  ;;  %v623_v33 = vxor.u32 2147483648, %v2504_v40 }
  0xa9   : > { %vm3253_vm12 = vcmp.le.f32.partialorder %v838_v12, 0.7853982  ;;  %v913_v19 = vor.u32 %v912_v21, %v911_v39  ;;  %v916_v31 = vshll.u32 %v915_v53, 23  ;;  %v1039_v4 = vsel %vm1037_vm11, %v3132_v56, %v415_v22  ;;  %v1605_v53 = vld [vmem:[%s3559_s2 + $0x30] sm:$0xff]  ;;  %v1823_v11 = vld [vmem:[%s3561_s4] sm:$0xff] }
  0xaa   : > { %v627_v55 = vsel %vm625_vm7, %v626_v20, %v2504_v40  ;;  %v3263_v32 = vmul.u32.u64.low %v3205_v41, %v777_v5  ;;  %v3264_v38 = vmul.u32.u64.high %v3205_v41, %v777_v5, %v3263_v32  ;;  %vm1040_vm13 = vcmp.eq.s32.totalorder %v3223_v30, 2  ;;  %v1606_v5 = vld [vmem:[%s3559_s2 + $0x38] sm:$0xff] }
  0xab   : > { %v624_v12 = vsel %vm622_vm10, %v2502_v43, %v623_v33  ;;  %v917_v0 = vor.u32 4788187, %v916_v31  ;;  %v920_v44 = vcvt.s32.f32 %v913_v19  ;;  %v1042_v36 = vsel %vm1040_vm13, %v418_v54, %v3138_v15  ;;  %v1824_v19 = vld [vmem:[%s3561_s4 + $0x8] sm:$0xff] }
  0xac   : > { %v628_v22 = vsel %vm621_vm4, %v624_v12, %v627_v55  ;;  %v924_v60 = vsub.s32 4, %v3172_v49  ;;  %v789_v34 = vmul.u32 %v3205_v41, %v773_v13  ;;  %v1043_v61 = vsel %vm1036_vm6, %v1039_v4, %v1042_v36  ;;  %v1603_v13 = vld [vmem:[%s3559_s2 + $0x20] sm:$0xff] }
  0xad   : > { %v629_v42 = vsel %vm618_vm3, nan, %v628_v22  ;;  %v918_v48 = vand.u32 2147483647, %v917_v0  ;;  %vm791_vm7 = vc.u32 %v3248_v51, %v3263_v32  ;;  %vm1242_vm10 = vcmp.lt.s32.totalorder %v3227_v46, 2  ;;  %v1825_v0 = vld [vmem:[%s3561_s4 + $0x10] sm:$0xff]  ;;  %v1826_v22 = vld [vmem:[%s3561_s4 + $0x18] sm:$0xff] }
  0xae   : > { %v1562_v56 = vpack.c.bf16 %v629_v42, %v3201_v57  ;;  %v792_v15 = vadd.s32 1, %v3264_v38  ;;  %vm1243_vm4 = vcmp.eq.s32.totalorder %v3227_v46, 0  ;;  %vm1246_vm14 = vcmp.eq.s32.totalorder %v3227_v46, 2  ;;  %v1601_v46 = vld [vmem:[%s3559_s2 + $0x10] sm:$0xff] }
  0xaf   : > { %v921_v54 = vmul.f32 %v920_v44, %v918_v48  ;;  %v3290_v25 = vsel %vm410_vm8, nan, %v1043_v61  ;;  %v1245_v41 = vsel %vm1243_vm4, %v2502_v43, %v623_v33  ;;  %v1248_v30 = vsel %vm1246_vm14, %v626_v20, %v2504_v40 }
  0xb0   : > { %v3295_v27 = vrot.slane %v1562_v56, 4  ;;  %v793_v57 = vsel %vm791_vm7, %v792_v15, %v3264_v38  ;;  %v1249_v16 = vsel %vm1242_vm10, %v1245_v41, %v1248_v30  ;;  %v925_v17 = vsel %vm840_vm0, %v924_v60, %v3172_v49  ;;  %v1827_v56 = vld [vmem:[%s3561_s4 + $0x20] sm:$0xff] }
  0xb1   : > { %v922_v3 = vxor.u32 2147483648, %v921_v54  ;;  %v794_v8 = vadd.s32 %v793_v57, %v789_v34  ;;  %v3306_v29 = vsel %vm618_vm3, nan, %v1249_v16  ;;  %v2585_v24 = vmov 0  }
  0xb2   : > { %1718 = vmatprep.mubr.bf16.mxu0 %v2585_v24  ;;  %2477 = vset.pattern.permute.xlu0 %v2585_v24  ;;  %v1585_v23 = vsel %vm312_vm1, %v1560_v28, %v3295_v27  ;;  %v1566_v50 = vpack.c.bf16 %v3306_v29, %v3290_v25  ;;  %v3328_v28 = vsel %vm3253_vm12, 0, %v925_v17  ;;  %vm930_vm5 = vweird.f32 %v2932_v62 }
  0xb3   : > { %1609 = vperm.xlu0 %2477, %v1599_v7   ;;  %2478 = vset.pattern.permute.xlu1 %v2585_v24  ;;  %v923_v52 = vsel %vm840_vm0, %v922_v3, %v921_v54  ;;  %v795_v49 = vadd.s32 536870912, %v794_v8  ;;  %v931_v39 = vadd.s32 3, %v3328_v28  ;;  %v790_v12 = vadd.s32 %v3263_v32, %v3248_v51  ;;  %v1828_v54 = vld [vmem:[%s3561_s4 + $0x28] sm:$0xff]  ;;  %v1830_v3 = vld [vmem:[%s3561_s4 + $0x38] sm:$0xff] }
  0xb4   : > { %1687 = vmatpush1.bf16.msra.mxu0 %v1585_v23  ;;  %1619 = vperm.xlu1 %2478, %v1601_v46   ;;  %v926_v1 = vsel %vm3253_vm12, %v2932_v62, %v923_v52  ;;  %v1829_v46 = vld [vmem:[%s3561_s4 + $0x30] sm:$0xff]  ;;  %vm736_vm6 = vcmp.lt.s32.totalorder %v3115_v45, 0  ;;  %vm735_vm0 = vcmp.le.f32.partialorder %v734_v26, 0.7853982  ;;  %v1550_v26 = vand.u32 3, %v3328_v28 }
  0xb5   : > { %1936 = vmatprep.mubr.bf16.mxu1 %v2585_v24  ;;  %2505 = vcosq.f32 %v926_v1  ;;  %v3334_v35 = vshrl.u32 %v795_v49, 30  ;;  %v932_v43 = vand.u32 3, %v931_v39  ;;  %v2038_v52 = vld [vmem:[%s3563_s6 + $0x10] sm:$0xff]  ;;  %vm826_vm14 = vweird.f32 %v3115_v45 }
  0xb6   : > { %2507 = vsinq.f32 %v926_v1  ;;  %vm1552_vm12 = vcmp.eq.s32.totalorder %v1550_v26, 0  ;;  %vm1555_vm13 = vcmp.eq.s32.totalorder %v1550_v26, 2 }
  0xb7   : > { %1614 = vperm.xlu0 %2477, %v1600_v58   ;;  %v797_v2 = vshll.u32 %v3334_v35, 30  ;;  %vm937_vm8 = vcmp.eq.s32.totalorder %v932_v43, 2  ;;  %vm934_vm2 = vcmp.eq.s32.totalorder %v932_v43, 0  ;;  %vm933_vm3 = vcmp.lt.s32.totalorder %v932_v43, 2 }
  0xb8   : > { %1624 = vperm.xlu1 %2478, %v1602_v37   ;;  %v2036_v37 = vld [vmem:[%s3563_s6] sm:$0xff] }
  0xb9   : > { %v798_v63 = vsub.s32 %v794_v8, %v797_v2  ;;  %v820_v8 = vsub.s32 4, %v3334_v35 }
  0xbb   : > { %1629 = vperm.xlu0 %2477, %v1603_v13   ;;  %v800_v21 = vsub.s32 0, %v798_v63  ;;  %v821_v58 = vsel %vm736_vm6, %v820_v8, %v3334_v35 }
  0xbc   : > { %1634 = vperm.xlu1 %2478, %v1604_v10   ;;  %v823_v2 = vsel %vm735_vm0, 0, %v821_v58 }
  0xbd   : > { %v2341_v18 = vmin.u32 %v800_v21, %v798_v63  ;;  %v827_v13 = vadd.s32 3, %v823_v2 }
  0xbf   : > { %1639 = vperm.xlu0 %2477, %v1605_v53   ;;  %v3350_v40 = vpop.eup %2505  ;;  %v802_v20 = vclz %v2341_v18  ;;  %v828_v10 = vand.u32 3, %v827_v13 }
  0xc0   : > { %1644 = vperm.xlu1 %2478, %v1606_v5   ;;  %v3355_v33 = vpop.eup %2507  ;;  %v938_v59 = vxor.u32 2147483648, %v3350_v40 }
  0xc1   : > { %v935_v31 = vxor.u32 2147483648, %v3355_v33  ;;  %v2342_v4 = vadd.s32 4294967294, %v802_v20  ;;  %vm833_vm11 = vcmp.eq.s32.totalorder %v828_v10, 2  ;;  %vm830_vm7 = vcmp.eq.s32.totalorder %v828_v10, 0 }
  0xc2   : > { %v939_v55 = vsel %vm937_vm8, %v938_v59, %v3355_v33  ;;  %vm829_vm8 = vcmp.lt.s32.totalorder %v828_v10, 2  ;;  %v1557_v28 = vsel %vm1555_vm13, %v938_v59, %v3355_v33 }
  0xc3   : > { %1833 = vperm.xlu0 %2477, %v1823_v11   ;;  %v936_v38 = vsel %vm934_vm2, %v3350_v40, %v935_v31  ;;  %vm2343_vm15 = vcmp.lt.s32.totalorder %v2342_v4, 0  ;;  %vm1551_vm2 = vcmp.lt.s32.totalorder %v1550_v26, 2  ;;  %v1554_v20 = vsel %vm1552_vm12, %v3350_v40, %v935_v31 }
  0xc4   : > { %1838 = vperm.xlu1 %2478, %v1824_v19   ;;  %v940_v44 = vsel %vm933_vm3, %v936_v38, %v939_v55  ;;  %v805_v36 = vsel %vm2343_vm15, 0, %v2342_v4 }
  0xc5   : > { %v941_v60 = vsel %vm930_vm5, nan, %v940_v44  ;;  %v806_v34 = vsub.s32 32, %v805_v36  ;;  %v807_v61 = vshll.u32 %v798_v63, %v805_v36  ;;  %v810_v42 = vsub.s32 4294967266, %v805_v36 }
  0xc6   : > { %v1565_v48 = vpack.c.bf16 %v941_v60, %v941_v60  ;;  %v1447_v63 = vand.u32 3, %v823_v2 }
  0xc7   : > { %1843 = vperm.xlu0 %2477, %v1825_v0   ;;  %v808_v51 = vshrl.u32 %v790_v12, %v806_v34  ;;  %v811_v32 = vadd.s32 127, %v810_v42  ;;  %v1558_v12 = vsel %vm1551_vm2, %v1554_v20, %v1557_v28 }
  0xc8   : > { %1848 = vperm.xlu1 %2478, %v1826_v22   ;;  %v1579_v15 = vrot.slane %v1565_v48, 4  ;;  %vm1449_vm10 = vcmp.eq.s32.totalorder %v1447_v63, 0  ;;  %vm1452_vm4 = vcmp.eq.s32.totalorder %v1447_v63, 2  ;;  %vm1448_vm3 = vcmp.lt.s32.totalorder %v1447_v63, 2 }
  0xc9   : > { %v809_v41 = vor.u32 %v808_v51, %v807_v61  ;;  %v812_v30 = vshll.u32 %v811_v32, 23  ;;  %v1559_v36 = vsel %vm930_vm5, nan, %v1558_v12  ;;  %vm1667_vm5 = vcmask 457728  }
  0xca   : > { %v1580_v7 = vsel %vm312_vm1, %v3076_v14, %v1579_v15  ;;  %v2037_v14 = vld [vmem:[%s3563_s6 + $0x8] sm:$0xff]  ;;  %v1569_v40 = vpack.c.bf16 %v1559_v36, %v1559_v36 }
  0xcb   : > { %1853 = vperm.xlu0 %2477, %v1827_v56   ;;  %1688 = vmatprep.subr.bf16.mxu0 %v1580_v7  ;;  %v813_v57 = vor.u32 4788187, %v812_v30  ;;  %v816_v16 = vcvt.s32.f32 %v809_v41 }
  0xcc   : > { %1858 = vperm.xlu1 %2478, %v1828_v54  }
  0xcd   : > { %v814_v17 = vand.u32 2147483647, %v813_v57 }
  0xcf   : > { %1863 = vperm.xlu0 %2477, %v1829_v46   ;;  %v817_v23 = vmul.f32 %v816_v16, %v814_v17 }
  0xd0   : > { %1868 = vperm.xlu1 %2478, %v1830_v3  }
  0xd1   : > { %v818_v49 = vxor.u32 2147483648, %v817_v23 }
  0xd3   : > { %2046 = vperm.xlu0 %2477, %v2037_v14   ;;  %v819_v1 = vsel %vm736_vm6, %v818_v49, %v817_v23 }
  0xd4   : > { %2051 = vperm.xlu1 %2478, %v2038_v52   ;;  %v822_v39 = vsel %vm735_vm0, %v3115_v45, %v819_v1  ;;  %v2479_v45 = vld [vmem:[%s3558_s1] sm:$0xff]  }
  0xd5   : > { %2509 = vcosq.f32 %v822_v39 }
  0xd6   : > { %2511 = vsinq.f32 %v822_v39 }
  0xd7   : > { %2041 = vperm.xlu0 %2477, %v2036_v37  }
  0xdf   : > { %v2510_v43 = vpop.eup %2509 }
  0xe0   : > { %v2512_v35 = vpop.eup %2511  ;;  %v834_v21 = vxor.u32 2147483648, %v2510_v43 }
  0xe1   : > { %v831_v53 = vxor.u32 2147483648, %v2512_v35 }
  0xe2   : > { %v835_v5 = vsel %vm833_vm11, %v834_v21, %v2512_v35  ;;  %v1454_v19 = vsel %vm1452_vm4, %v834_v21, %v2512_v35 }
  0xe3   : > { %v832_v18 = vsel %vm830_vm7, %v2510_v43, %v831_v53  ;;  %v1451_v11 = vsel %vm1449_vm10, %v2510_v43, %v831_v53 }
  0xe4   : > { %v836_v4 = vsel %vm829_vm8, %v832_v18, %v835_v5  ;;  %v1455_v0 = vsel %vm1448_vm3, %v1451_v11, %v1454_v19 }
  0xe5   : > { %v837_v55 = vsel %vm826_vm14, nan, %v836_v4  ;;  %v1456_v59 = vsel %vm826_vm14, nan, %v1455_v0 }
  0xe6   : > { %v1564_v38 = vpack.c.bf16 %v837_v55, %v837_v55  ;;  %v1568_v31 = vpack.c.bf16 %v1456_v59, %v1456_v59 }
  0xe8   : > { %v1577_v44 = vrot.slane %v1564_v38, 4  ;;  %v1681_v62 = vsel %vm312_vm1, %v1568_v31, 0 }
  0xea   : > { %v1578_v33 = vsel %vm312_vm1, %v3295_v27, %v1577_v44 }
  0xeb   : > { %1689 = vmatpush1.bf16.msra.mxu0 %v1578_v33 }
  0xec   : > { %1690 = vmatprep.subr.bf16.mxu0 %v1567_v9  ;;  %v2482_v9 = vld [vmem:[%s3558_s1 + $0x18] sm:$0xff]  }
  0xef   : > { %1691 = vmatpush1.bf16.msra.mxu0 %v1566_v50 }
  0xf0   : > { %2376 = vmatprep.subr.msk.bf16.mxu0 %vm312_vm1, %v1569_v40 }
  0xf3   : > { %1693 = vmatpush1.bf16.msra.mxu0 %v1681_v62 }
  0xf6   : > { %2377 = vmatmul.mubr.msk.bf16.vlgmr.msra.gmra.mrb[0].mxu0 %vm1667_vm5, %v2479_v45 }
  0xf7   : > { %1728 = vmatprep.mubr.bf16.mxu0 %v2585_v24 }
  0xfe   : > { %2378 = vmatmul.mubr.msk.bf16.gmra.mrb[4].mxu0 %vm1667_vm5, %v2480_v47 }
  0xff   : > { %1738 = vmatprep.mubr.bf16.mxu0 %v2585_v24 }
 0x106   : > { %2379 = vmatmul.mubr.msk.bf16.gmra.mrb[8].mxu0 %vm1667_vm5, %v2481_v6 }
 0x107   : > { %1748 = vmatprep.mubr.bf16.mxu0 %v2585_v24 }
 0x10e   : > { %2380 = vmatmul.mubr.msk.bf16.gmra.mrb[12].mxu0 %vm1667_vm5, %v2482_v9 }
 0x10f   : > { %2100 = vmatprep.mubr.bf16.mxu0 %v2585_v24 }
 0x132   : > { %v1610_v25 = vpop.permute.xlu0 %1609 }
 0x133   : > { %v1620_v51 = vpop.permute.xlu1 %1619 }
 0x136   : > { %v1615_v22 = vpop.permute.xlu0 %1614 }
 0x137   : > { %v1625_v23 = vpop.permute.xlu1 %1624 }
 0x13a   : > { %v1630_v63 = vpop.permute.xlu0 %1629 }
 0x13b   : > { %v1635_v20 = vpop.permute.xlu1 %1634 }
 0x13e   : > { %v1640_v40 = vpop.permute.xlu0 %1639 }
 0x1c9   : > { %v1720_v27 = vpop.f32.mrb[0].mxu0 }
 0x1ca   : > { %v1721_v29 = vadd.f32 %v1720_v27, %v1610_v25  ;;  %v1722_v50 = vpop.f32.mrb[1].mxu0  ;;  %v1645_v27 = vpop.permute.xlu1 %1644 }
 0x1cb   : > { %v1723_v60 = vadd.f32 %v1722_v50, %v1610_v25  ;;  %v1724_v34 = vpop.f32.mrb[2].mxu0 }
 0x1cc   : > { %v1775_v61 = vmul.f32 0.01, %v1721_v29  ;;  %v1725_v42 = vadd.f32 %v1724_v34, %v1615_v22  ;;  %v1726_v48 = vpop.f32.mrb[3].mxu0  ;;  %vm1759_vm1 = vcmp.gt.f32.partialorder %v1721_v29, 0.0 }
 0x1cd   : > { %v1776_v32 = vmul.f32 0.01, %v1723_v60  ;;  %v1727_v56 = vadd.f32 %v1726_v48, %v1615_v22  ;;  %vm1760_vm15 = vcmp.gt.f32.partialorder %v1723_v60, 0.0 }
 0x1ce   : > { %v1777_v15 = vmul.f32 0.01, %v1725_v42  ;;  %vm1761_vm6 = vcmp.gt.f32.partialorder %v1725_v42, 0.0  ;;  %v1791_v41 = vsel %vm1759_vm1, %v1721_v29, %v1775_v61 }
 0x1cf   : > { %v1778_v54 = vmul.f32 0.01, %v1727_v56  ;;  %vm1762_vm0 = vcmp.gt.f32.partialorder %v1727_v56, 0.0  ;;  %v1792_v57 = vsel %vm1760_vm15, %v1723_v60, %v1776_v32  ;;  %vm1891_vm15 = vcmask 523264  }
 0x1d0   : > { %v1793_v30 = vsel %vm1761_vm6, %v1725_v42, %v1777_v15 }
 0x1d1   : > { %v1730_v7 = vpop.f32.mrb[4].mxu0  ;;  %v1794_v16 = vsel %vm1762_vm0, %v1727_v56, %v1778_v54  ;;  %v1815_v46 = vpack.c.bf16 %v1793_v30, %v1791_v41 }
 0x1d2   : > { %v1731_v3 = vadd.f32 %v1730_v7, %v1620_v51  ;;  %v1732_v17 = vpop.f32.mrb[5].mxu0  ;;  %v1816_v8 = vpack.c.bf16 %v1794_v16, %v1792_v57  ;;  %v2483_v7 = vld [vmem:[%s3560_s3] sm:$0xff]   ;;  %v2484_v57 = vld [vmem:[%s3560_s3 + $0x8] sm:$0xff]   ;;  %v2485_v16 = vld [vmem:[%s3560_s3 + $0x10] sm:$0xff]  }
 0x1d3   : > { %v1733_v14 = vadd.f32 %v1732_v17, %v1620_v51  ;;  %v1734_v52 = vpop.f32.mrb[6].mxu0 }
 0x1d4   : > { %v1779_v49 = vmul.f32 0.01, %v1731_v3  ;;  %v1735_v58 = vadd.f32 %v1734_v52, %v1625_v23  ;;  %v1736_v1 = vpop.f32.mrb[7].mxu0  ;;  %1904 = vmatprep.subr.bf16.mxu1 %v1816_v8  ;;  %vm1763_vm11 = vcmp.gt.f32.partialorder %v1731_v3, 0.0 }
 0x1d5   : > { %v1780_v37 = vmul.f32 0.01, %v1733_v14  ;;  %v1737_v39 = vadd.f32 %v1736_v1, %v1625_v23  ;;  %1905 = vmatpush1.bf16.msra.mxu1 %v1815_v46  ;;  %vm1764_vm12 = vcmp.gt.f32.partialorder %v1733_v14, 0.0  ;;  %v2486_v46 = vld [vmem:[%s3560_s3 + $0x18] sm:$0xff]  }
 0x1d6   : > { %vm1765_vm13 = vcmp.gt.f32.partialorder %v1735_v58, 0.0  ;;  %v1781_v2 = vmul.f32 0.01, %v1735_v58  ;;  %v1795_v10 = vsel %vm1763_vm11, %v1731_v3, %v1779_v49  ;;  %v1834_v3 = vpop.permute.xlu0 %1833 }
 0x1d7   : > { %vm1766_vm7 = vcmp.gt.f32.partialorder %v1737_v39, 0.0  ;;  %v1782_v13 = vmul.f32 0.01, %v1737_v39  ;;  %v1796_v35 = vsel %vm1764_vm12, %v1733_v14, %v1780_v37  ;;  %v1839_v14 = vpop.permute.xlu1 %1838 }
 0x1d8   : > { %v1797_v26 = vsel %vm1765_vm13, %v1735_v58, %v1781_v2 }
 0x1d9   : > { %v1740_v43 = vpop.f32.mrb[8].mxu0  ;;  %v1798_v21 = vsel %vm1766_vm7, %v1737_v39, %v1782_v13  ;;  %v1817_v53 = vpack.c.bf16 %v1797_v26, %v1795_v10 }
 0x1da   : > { %v1741_v5 = vadd.f32 %v1740_v43, %v1630_v63  ;;  %v1742_v28 = vpop.f32.mrb[9].mxu0  ;;  %v1818_v18 = vpack.c.bf16 %v1798_v21, %v1796_v35 }
 0x1db   : > { %v1743_v11 = vadd.f32 %v1742_v28, %v1630_v63  ;;  %v1744_v19 = vpop.f32.mrb[10].mxu0  ;;  %v1844_v63 = vpop.permute.xlu0 %1843 }
 0x1dc   : > { %v1783_v4 = vmul.f32 0.01, %v1741_v5  ;;  %v1745_v55 = vadd.f32 %v1744_v19, %v1635_v20  ;;  %v1746_v38 = vpop.f32.mrb[11].mxu0  ;;  %1906 = vmatprep.subr.bf16.mxu1 %v1818_v18  ;;  %vm1767_vm10 = vcmp.gt.f32.partialorder %v1741_v5, 0.0 }
 0x1dd   : > { %v1784_v12 = vmul.f32 0.01, %v1743_v11  ;;  %v1747_v0 = vadd.f32 %v1746_v38, %v1635_v20  ;;  %1907 = vmatpush1.bf16.msra.mxu1 %v1817_v53  ;;  %vm1768_vm4 = vcmp.gt.f32.partialorder %v1743_v11, 0.0  ;;  %v1849_v20 = vpop.permute.xlu1 %1848 }
 0x1de   : > { %vm1769_vm14 = vcmp.gt.f32.partialorder %v1745_v55, 0.0  ;;  %v1785_v44 = vmul.f32 0.01, %v1745_v55  ;;  %v1799_v59 = vsel %vm1767_vm10, %v1741_v5, %v1783_v4 }
 0x1df   : > { %vm1770_vm8 = vcmp.gt.f32.partialorder %v1747_v0, 0.0  ;;  %v1786_v36 = vmul.f32 0.01, %v1747_v0  ;;  %v1800_v62 = vsel %vm1768_vm4, %v1743_v11, %v1784_v12 }
 0x1e0   : > { %v1801_v33 = vsel %vm1769_vm14, %v1745_v55, %v1785_v44 }
 0x1e1   : > { %v1750_v31 = vpop.f32.mrb[12].mxu0  ;;  %v1802_v45 = vsel %vm1770_vm8, %v1747_v0, %v1786_v36  ;;  %v1819_v47 = vpack.c.bf16 %v1801_v33, %v1799_v59 }
 0x1e2   : > { %v1751_v6 = vadd.f32 %v1750_v31, %v1640_v40  ;;  %v1752_v9 = vpop.f32.mrb[13].mxu0  ;;  %v1820_v25 = vpack.c.bf16 %v1802_v45, %v1800_v62 }
 0x1e3   : > { %v1753_v29 = vadd.f32 %v1752_v9, %v1640_v40  ;;  %v1754_v50 = vpop.f32.mrb[14].mxu0  ;;  %v1854_v40 = vpop.permute.xlu0 %1853 }
 0x1e4   : > { %v1787_v22 = vmul.f32 0.01, %v1751_v6  ;;  %v1755_v60 = vadd.f32 %v1754_v50, %v1645_v27  ;;  %v1756_v34 = vpop.f32.mrb[15].mxu0  ;;  %1908 = vmatprep.subr.bf16.mxu1 %v1820_v25  ;;  %vm1771_vm2 = vcmp.gt.f32.partialorder %v1751_v6, 0.0 }
 0x1e5   : > { %v1788_v61 = vmul.f32 0.01, %v1753_v29  ;;  %v1757_v42 = vadd.f32 %v1756_v34, %v1645_v27  ;;  %1909 = vmatpush1.bf16.msra.mxu1 %v1819_v47  ;;  %vm1772_vm3 = vcmp.gt.f32.partialorder %v1753_v29, 0.0  ;;  %v1859_v27 = vpop.permute.xlu1 %1858 }
 0x1e6   : > { %vm1773_vm5 = vcmp.gt.f32.partialorder %v1755_v60, 0.0  ;;  %v1789_v48 = vmul.f32 0.01, %v1755_v60  ;;  %v1803_v32 = vsel %vm1771_vm2, %v1751_v6, %v1787_v22 }
 0x1e7   : > { %vm1774_vm1 = vcmp.gt.f32.partialorder %v1757_v42, 0.0  ;;  %v1790_v51 = vmul.f32 0.01, %v1757_v42  ;;  %v1804_v15 = vsel %vm1772_vm3, %v1753_v29, %v1788_v61 }
 0x1e8   : > { %v1805_v56 = vsel %vm1773_vm5, %v1755_v60, %v1789_v48 }
 0x1e9   : > { %v1806_v54 = vsel %vm1774_vm1, %v1757_v42, %v1790_v51  ;;  %v1821_v41 = vpack.c.bf16 %v1805_v56, %v1803_v32 }
 0x1ea   : > { %v1822_v30 = vpack.c.bf16 %v1806_v54, %v1804_v15  ;;  %v1864_v15 = vpop.permute.xlu0 %1863 }
 0x1ec   : > { %1910 = vmatprep.subr.bf16.mxu1 %v1822_v30 }
 0x1ed   : > { %1911 = vmatpush1.bf16.msra.mxu1 %v1821_v41 }
 0x1f0   : > { %2385 = vmatmul.mubr.msk.bf16.vlgmr.msra.gmra.mrb[0].mxu1 %vm1891_vm15, %v2483_v7 }
 0x1f1   : > { %1946 = vmatprep.mubr.bf16.mxu1 %v2585_v24 }
 0x1f8   : > { %2386 = vmatmul.mubr.msk.bf16.gmra.mrb[4].mxu1 %vm1891_vm15, %v2484_v57 }
 0x1f9   : > { %1956 = vmatprep.mubr.bf16.mxu1 %v2585_v24 }
 0x200   : > { %2387 = vmatmul.mubr.msk.bf16.gmra.mrb[8].mxu1 %vm1891_vm15, %v2485_v16 }
 0x201   : > { %1966 = vmatprep.mubr.bf16.mxu1 %v2585_v24 }
 0x208   : > { %2388 = vmatmul.mubr.msk.bf16.gmra.mrb[12].mxu1 %vm1891_vm15, %v2486_v46 }
 0x209   : > { %2110 = vmatprep.mubr.bf16.mxu1 %v2585_v24 }
 0x2c3   : > { %v1938_v17 = vpop.f32.mrb[0].mxu1 }
 0x2c4   : > { %v1939_v8 = vadd.f32 %v1938_v17, %v1834_v3  ;;  %v1940_v23 = vpop.f32.mrb[1].mxu1 }
 0x2c5   : > { %v1941_v52 = vadd.f32 %v1940_v23, %v1834_v3  ;;  %v1942_v49 = vpop.f32.mrb[2].mxu1  ;;  %v1869_v3 = vpop.permute.xlu1 %1868 }
 0x2c6   : > { %v1993_v58 = vmul.f32 0.01, %v1939_v8  ;;  %v1943_v1 = vadd.f32 %v1942_v49, %v1839_v14  ;;  %v1944_v37 = vpop.f32.mrb[3].mxu1  ;;  %vm1977_vm6 = vcmp.gt.f32.partialorder %v1939_v8, 0.0 }
 0x2c7   : > { %v1994_v39 = vmul.f32 0.01, %v1941_v52  ;;  %v1945_v2 = vadd.f32 %v1944_v37, %v1839_v14  ;;  %vm1978_vm0 = vcmp.gt.f32.partialorder %v1941_v52, 0.0 }
 0x2c8   : > { %vm1979_vm11 = vcmp.gt.f32.partialorder %v1943_v1, 0.0  ;;  %v1995_v13 = vmul.f32 0.01, %v1943_v1  ;;  %v2009_v26 = vsel %vm1977_vm6, %v1939_v8, %v1993_v58 }
 0x2c9   : > { %vm1980_vm12 = vcmp.gt.f32.partialorder %v1945_v2, 0.0  ;;  %v1996_v10 = vmul.f32 0.01, %v1945_v2  ;;  %v2010_v21 = vsel %vm1978_vm0, %v1941_v52, %v1994_v39 }
 0x2ca   : > { %v2011_v24 = vsel %vm1979_vm11, %v1943_v1, %v1995_v13 }
 0x2cb   : > { %v2028_v43 = vpack.c.bf16 %v2011_v24, %v2009_v26  ;;  %v1948_v35 = vpop.f32.mrb[4].mxu1  ;;  %v2012_v53 = vsel %vm1980_vm12, %v1945_v2, %v1996_v10 }
 0x2cc   : > { %v1949_v5 = vadd.f32 %v1948_v35, %v1844_v63  ;;  %v1950_v28 = vpop.f32.mrb[5].mxu1  ;;  %v2029_v18 = vpack.c.bf16 %v2012_v53, %v2010_v21  ;;  %v2047_v35 = vpop.permute.xlu0 %2046 }
 0x2cd   : > { %v1951_v11 = vadd.f32 %v1950_v28, %v1844_v63  ;;  %v1952_v19 = vpop.f32.mrb[6].mxu1  ;;  %v2487_v63 = vld [vmem:[%s3562_s5] sm:$0xff]   ;;  %v2052_v53 = vpop.permute.xlu1 %2051 }
 0x2ce   : > { %v1997_v4 = vmul.f32 0.01, %v1949_v5  ;;  %v1953_v55 = vadd.f32 %v1952_v19, %v1849_v20  ;;  %v1954_v38 = vpop.f32.mrb[7].mxu1  ;;  %2068 = vmatprep.subr.bf16.mxu0 %v2029_v18  ;;  %2399 = vmatprep.subr.bf16.mxu1 %v2029_v18  ;;  %vm1981_vm13 = vcmp.gt.f32.partialorder %v1949_v5, 0.0 }
 0x2cf   : > { %v1998_v12 = vmul.f32 0.01, %v1951_v11  ;;  %v1955_v0 = vadd.f32 %v1954_v38, %v1849_v20  ;;  %2069 = vmatpush1.bf16.msra.mxu0 %v2028_v43  ;;  %2403 = vmatpush1.bf16.msra.mxu1 %v2028_v43  ;;  %vm1982_vm7 = vcmp.gt.f32.partialorder %v1951_v11, 0.0  ;;  %v2488_v43 = vld [vmem:[%s3562_s5 + $0x8] ss:$0 sps:$4 sm:$0xff]  }
 0x2d0   : > { %vm1983_vm10 = vcmp.gt.f32.partialorder %v1953_v55, 0.0  ;;  %v1999_v44 = vmul.f32 0.01, %v1953_v55  ;;  %v2013_v59 = vsel %vm1981_vm13, %v1949_v5, %v1997_v4  ;;  %v2042_v21 = vpop.permute.xlu0 %2041 }
 0x2d1   : > { %vm1984_vm4 = vcmp.gt.f32.partialorder %v1955_v0, 0.0  ;;  %v2000_v36 = vmul.f32 0.01, %v1955_v0  ;;  %v2014_v45 = vsel %vm1982_vm7, %v1951_v11, %v1998_v12 }
 0x2d2   : > { %v2015_v33 = vsel %vm1983_vm10, %v1953_v55, %v1999_v44 }
 0x2d3   : > { %v2030_v31 = vpack.c.bf16 %v2015_v33, %v2013_v59  ;;  %v1958_v62 = vpop.f32.mrb[8].mxu1  ;;  %v2016_v47 = vsel %vm1984_vm4, %v1955_v0, %v2000_v36  ;;  %v2513_v0 = vld [vmem:[%s2679_s17] sm:$0xff] }
 0x2d4   : > { %v1959_v6 = vadd.f32 %v1958_v62, %v1854_v40  ;;  %v1960_v9 = vpop.f32.mrb[9].mxu1  ;;  %v2031_v25 = vpack.c.bf16 %v2016_v47, %v2014_v45 }
 0x2d5   : > { %v1961_v29 = vadd.f32 %v1960_v9, %v1854_v40  ;;  %v1962_v50 = vpop.f32.mrb[10].mxu1 }
 0x2d6   : > { %v2001_v22 = vmul.f32 0.01, %v1959_v6  ;;  %v1963_v60 = vadd.f32 %v1962_v50, %v1859_v27  ;;  %v1964_v34 = vpop.f32.mrb[11].mxu1  ;;  %2070 = vmatprep.subr.bf16.mxu0 %v2031_v25  ;;  %2400 = vmatprep.subr.bf16.mxu1 %v2031_v25  ;;  %vm1985_vm14 = vcmp.gt.f32.partialorder %v1959_v6, 0.0 }
 0x2d7   : > { %v2002_v61 = vmul.f32 0.01, %v1961_v29  ;;  %v1965_v42 = vadd.f32 %v1964_v34, %v1859_v27  ;;  %2071 = vmatpush1.bf16.msra.mxu0 %v2030_v31  ;;  %2404 = vmatpush1.bf16.msra.mxu1 %v2030_v31  ;;  %vm1986_vm8 = vcmp.gt.f32.partialorder %v1961_v29, 0.0  ;;  %v2514_v31 = vld [vmem:[%s2679_s17 + $0x8] sm:$0xff]  ;;  %s270_s17 = sand.u32 1, %s2569_s25  }
 0x2d8   : > { %vm1987_vm2 = vcmp.gt.f32.partialorder %v1963_v60, 0.0  ;;  %v2003_v48 = vmul.f32 0.01, %v1963_v60  ;;  %v2017_v32 = vsel %vm1985_vm14, %v1959_v6, %v2001_v22  ;;  %s2321_s29 = sshll.u32 %s270_s17, 3  ;;  %s2244_s28 = scalar_lea.sflag [#allocation3], %s270_s17 }
 0x2d9   : > { %vm1988_vm3 = vcmp.gt.f32.partialorder %v1965_v42, 0.0  ;;  %v2004_v51 = vmul.f32 0.01, %v1965_v42  ;;  %v2018_v30 = vsel %vm1986_vm8, %v1961_v29, %v2002_v61  ;;  %s272_s9 = scalar_lea.vmem [#allocation2], %s2321_s29 }
 0x2da   : > { %v2019_v56 = vsel %vm1987_vm2, %v1963_v60, %v2003_v48  ;;  %s2258_s13 = sshll.u32 %s272_s9, 4  ;;  %s3515_s13 = int_to_ptr.vmem [resolvable:$true] %s2258_s13 }
 0x2db   : > { %v2032_v54 = vpack.c.bf16 %v2019_v56, %v2017_v32  ;;  %v1968_v41 = vpop.f32.mrb[12].mxu1  ;;  %v2020_v7 = vsel %vm1988_vm3, %v1965_v42, %v2004_v51  ;;  %s2515_s18 = scalar_lea.vmem %s3515_s13, 128  ;;  %p2522_p0 = scmp.lt.s32.totalorder %s3515_s13, %s2520_s20 }
 0x2dc   : > { %v1969_v57 = vadd.f32 %v1968_v41, %v1864_v15  ;;  %v1970_v16 = vpop.f32.mrb[13].mxu1  ;;  %v2033_v46 = vpack.c.bf16 %v2020_v7, %v2018_v30  ;;  %p2516_p11 = scmp.ne.s32.totalorder %s3515_s13, %s2515_s18  ;;  %p2523_p1 = scmp.lt.s32.totalorder %s2521_s21, %s2515_s18 }
 0x2dd   : > { %v1971_v17 = vadd.f32 %v1970_v16, %v1864_v15  ;;  %v1972_v8 = vpop.f32.mrb[14].mxu1 }
 0x2de   : > { %v2005_v23 = vmul.f32 0.01, %v1969_v57  ;;  %v1973_v14 = vadd.f32 %v1972_v8, %v1869_v3  ;;  %v1974_v52 = vpop.f32.mrb[15].mxu1  ;;  %2072 = vmatprep.subr.bf16.mxu0 %v2033_v46  ;;  %2401 = vmatprep.subr.bf16.mxu1 %v2033_v46  ;;  %vm1989_vm5 = vcmp.gt.f32.partialorder %v1969_v57, 0.0  ;;  %p2517_p12 = pnand %p2516_p11, %p2665_p5  ;;  %p2524_p2 = por %p2523_p1, %p2522_p0 }
 0x2df   : > { %v2006_v49 = vmul.f32 0.01, %v1971_v17  ;;  %v1975_v58 = vadd.f32 %v1974_v52, %v1869_v3  ;;  %2073 = vmatpush1.bf16.msra.mxu0 %v2032_v54  ;;  %2405 = vmatpush1.bf16.msra.mxu1 %v2032_v54  ;;  %vm1990_vm1 = vcmp.gt.f32.partialorder %v1971_v17, 0.0 }
 0x2e0   : > { %vm1991_vm6 = vcmp.gt.f32.partialorder %v1973_v14, 0.0  ;;  %v2007_v1 = vmul.f32 0.01, %v1973_v14  ;;  %v2021_v39 = vsel %vm1989_vm5, %v1969_v57, %v2005_v23  ;;  %p2518_p13 = pneg %p2517_p12 }
 0x2e1   : > { %vm1992_vm0 = vcmp.gt.f32.partialorder %v1975_v58, 0.0  ;;  %v2008_v37 = vmul.f32 0.01, %v1975_v58  ;;  %v2022_v10 = vsel %vm1990_vm1, %v1971_v17, %v2006_v49 }
 0x2e2   : > { %v2023_v2 = vsel %vm1991_vm6, %v1973_v14, %v2007_v1  ;;  %p2525_p3 = pnand %p2524_p2, %p2518_p13 }
 0x2e3   : > { %v2034_v13 = vpack.c.bf16 %v2023_v2, %v2021_v39  ;;  %v2024_v26 = vsel %vm1992_vm0, %v1975_v58, %v2008_v37 }
 0x2e4   : > { %v2035_v24 = vpack.c.bf16 %v2024_v26, %v2022_v10 }
 0x2e6   : > { %2074 = vmatprep.subr.bf16.mxu0 %v2035_v24  ;;  %2402 = vmatprep.subr.bf16.mxu1 %v2035_v24 }
 0x2e7   : > { %2075 = vmatpush1.bf16.msra.mxu0 %v2034_v13  ;;  %2406 = vmatpush1.bf16.msra.mxu1 %v2034_v13 }
 0x2ea   : > { %2391 = vmatmul.mubr.msk.bf16.vlgmr.msra.gmra.mrb[16].mxu0 %vm1891_vm15, %v2487_v63  ;;  %2392 = vmatmul.mubr.msk.bf16.vlgmr.msra.gmra.mrb[16].mxu1 %vm1891_vm15, %v2488_v43  ;;  %vm2233_vm15 = vcmask 1040384  }
 0x3bd   : > { %v2102_v5 = vpop.f32.mrb[16].mxu0  ;;  %v2112_v28 = vpop.f32.mrb[16].mxu1 }
 0x3be   : > { %v2103_v18 = vadd.f32 %v2102_v5, %v2042_v21  ;;  %v2113_v20 = vadd.f32 %v2112_v28, %v2052_v53  ;;  %v2104_v11 = vpop.f32.mrb[17].mxu0  ;;  %v2114_v19 = vpop.f32.mrb[17].mxu1 }
 0x3bf   : > { %v2105_v4 = vadd.f32 %v2104_v11, %v2042_v21  ;;  %v2115_v55 = vadd.f32 %v2114_v19, %v2052_v53  ;;  %v2106_v38 = vpop.f32.mrb[18].mxu0  ;;  %v2116_v12 = vpop.f32.mrb[18].mxu1 }
 0x3c0   : > { %v2119_v44 = vmul.f32 %v2513_v0, %v2103_v18  ;;  %v3477_v36 = vmul.f32 %v2513_v0, %v2113_v20  ;;  %v2107_v59 = vadd.f32 %v2106_v38, %v2047_v35  ;;  %v2108_v33 = vpop.f32.mrb[19].mxu0  ;;  %v2117_v40 = vpop.f32.mrb[19].mxu1 }
 0x3c1   : > { %v3480_v62 = vmul.f32 %v2514_v31, %v2105_v4  ;;  %v3482_v45 = vmul.f32 %v2514_v31, %v2115_v55  ;;  %v2109_v47 = vadd.f32 %v2108_v33, %v2047_v35 }
 0x3c2   : > { %v2123_v6 = vrot.slane %v2119_v44, 1  ;;  %v2153_v9 = vmul.f32 %v2513_v0, %v2107_v59  ;;  %v2129_v50 = vrot.slane %v2119_v44, 2  ;;  %v2191_v22 = vrot.slane %v3477_v36, 1 }
 0x3c3   : > { %v2124_v25 = vrot.slane %v3480_v62, 1  ;;  %v2154_v27 = vmul.f32 %v2514_v31, %v2109_v47  ;;  %v2130_v61 = vrot.slane %v3480_v62, 2  ;;  %v2192_v42 = vrot.slane %v3482_v45, 1 }
 0x3c4   : > { %v2127_v29 = vadd.f32 %v2123_v6, %v2119_v44  ;;  %v2157_v60 = vrot.slane %v2153_v9, 1  ;;  %v2163_v32 = vrot.slane %v2153_v9, 2  ;;  %v2135_v15 = vrot.slane %v2119_v44, 3 }
 0x3c5   : > { %v2128_v34 = vadd.f32 %v2124_v25, %v3480_v62  ;;  %v2158_v48 = vrot.slane %v2154_v27, 1  ;;  %v2164_v41 = vrot.slane %v2154_v27, 2  ;;  %v2136_v7 = vrot.slane %v3480_v62, 3 }
 0x3c6   : > { %v2161_v51 = vadd.f32 %v2157_v60, %v2153_v9  ;;  %v2133_v56 = vadd.f32 %v2129_v50, %v2127_v29  ;;  %v2141_v16 = vrot.slane %v2119_v44, 4  ;;  %v2169_v3 = vrot.slane %v2153_v9, 3 }
 0x3c7   : > { %v2162_v54 = vadd.f32 %v2158_v48, %v2154_v27  ;;  %v2134_v30 = vadd.f32 %v2130_v61, %v2128_v34  ;;  %v2142_v8 = vrot.slane %v3480_v62, 4  ;;  %v2170_v14 = vrot.slane %v2154_v27, 3 }
 0x3c8   : > { %v2139_v57 = vadd.f32 %v2135_v15, %v2133_v56  ;;  %v2167_v46 = vadd.f32 %v2163_v32, %v2161_v51  ;;  %v2147_v52 = vrot.slane %v2119_v44, 5  ;;  %v2175_v58 = vrot.slane %v2153_v9, 4 }
 0x3c9   : > { %v2140_v17 = vadd.f32 %v2136_v7, %v2134_v30  ;;  %v2168_v23 = vadd.f32 %v2164_v41, %v2162_v54  ;;  %v2176_v1 = vrot.slane %v2154_v27, 4  ;;  %v2195_v2 = vadd.f32 %v2191_v22, %v3477_v36 }
 0x3ca   : > { %v2173_v49 = vadd.f32 %v2169_v3, %v2167_v46  ;;  %v2145_v37 = vadd.f32 %v2141_v16, %v2139_v57  ;;  %v2196_v13 = vadd.f32 %v2192_v42, %v3482_v45  ;;  %v2181_v26 = vrot.slane %v2153_v9, 5 }
 0x3cb   : > { %v2174_v39 = vadd.f32 %v2170_v14, %v2168_v23  ;;  %v2197_v24 = vrot.slane %v3477_v36, 2  ;;  %v2198_v63 = vrot.slane %v3482_v45, 2  ;;  %v2146_v43 = vadd.f32 %v2142_v8, %v2140_v17 }
 0x3cc   : > { %v2179_v10 = vadd.f32 %v2175_v58, %v2173_v49  ;;  %v2182_v21 = vrot.slane %v2154_v27, 5  ;;  %v2203_v53 = vrot.slane %v3477_v36, 3  ;;  %v2204_v20 = vrot.slane %v3482_v45, 3 }
 0x3cd   : > { %v2180_v35 = vadd.f32 %v2176_v1, %v2174_v39  ;;  %v2201_v28 = vadd.f32 %v2197_v24, %v2195_v2  ;;  %v2202_v18 = vadd.f32 %v2198_v63, %v2196_v13  ;;  %v2148_v11 = vrot.slane %v3480_v62, 5 }
 0x3ce   : > { %v2185_v5 = vadd.f32 %v2181_v26, %v2179_v10  ;;  %v2151_v19 = vadd.f32 %v2147_v52, %v2145_v37  ;;  %v2209_v55 = vrot.slane %v3477_v36, 4  ;;  %v2210_v0 = vrot.slane %v3482_v45, 4 }
 0x3cf   : > { %v2186_v4 = vadd.f32 %v2182_v21, %v2180_v35  ;;  %v2207_v38 = vadd.f32 %v2203_v53, %v2201_v28  ;;  %v2208_v12 = vadd.f32 %v2204_v20, %v2202_v18  ;;  %v2152_v59 = vadd.f32 %v2148_v11, %v2146_v43 }
 0x3d0   : > { %v2223_v44 = vrot.slane %v2185_v5, 7  ;;  %v2215_v33 = vrot.slane %v3477_v36, 5  ;;  %v2216_v62 = vrot.slane %v3482_v45, 5 }
 0x3d1   : > { %v2224_v40 = vrot.slane %v2186_v4, 7  ;;  %v2213_v31 = vadd.f32 %v2209_v55, %v2207_v38  ;;  %v2214_v47 = vadd.f32 %v2210_v0, %v2208_v12 }
 0x3d2   : > { %v2234_v6 = vsel %vm2233_vm15, %v2151_v19, %v2223_v44 }
 0x3d3   : > { %v2235_v9 = vsel %vm2233_vm15, %v2152_v59, %v2224_v40  ;;  %v2219_v25 = vadd.f32 %v2215_v33, %v2213_v31  ;;  %v2220_v27 = vadd.f32 %v2216_v62, %v2214_v47 }
 0x3d5   : > { %v2229_v29 = vrot.slane %v2219_v25, 6  ;;  %v2230_v50 = vrot.slane %v2220_v27, 6 }
 0x3d7   : > { %v2236_v36 = vsel %vm315_vm9, %v2234_v6, %v2229_v29  ;;  %v2237_v22 = vsel %vm315_vm9, %v2235_v9, %v2230_v50 }
 0x3d8   : > { %v2240_v60 = vcombine.low %v2236_v36, %v2237_v22 }
 0x3da   : > { %2242 = vst [vmem:[%s272_s9] sm:$0x77] %v2240_v60 }
 0x3db   : > { %2528 = shalt.err (!%p2525_p3)
}
 0x3dc   : > { %s2529_s22 = scalar_lea.hbm %s3513_s16, 128  ;;  %s2533_s29 = scalar_lea.hbm %s3564_s7, 256 }
 0x3dd   : > { %p2530_p4 = scmp.ne.s32.totalorder %s3513_s16, %s2529_s22  ;;  %p2534_p9 = scmp.lt.u32.totalorder %s3513_s16, %s3564_s7 }
 0x3de   : > { %p2535_p10 = scmp.lt.u32.totalorder %s2533_s29, %s2529_s22  ;;  %p2537_p12 = scmp.lt.u32.totalorder %s2529_s22, %s3513_s16 }
 0x3df   : > { %p2531_p7 = pnand %p2530_p4, %p2665_p5 }
 0x3e0   : > { %p2536_p11 = por %p2535_p10, %p2534_p9 }
 0x3e1   : > { %p2532_p8 = pneg %p2531_p7 }
 0x3e2   : > { %p2538_p13 = por %p2537_p12, %p2536_p11 }
 0x3e4   : > { %p2539_p0 = pnand %p2538_p13, %p2532_p8 }
 0x3e6   : > { %2542 = shalt.err (!%p2539_p0)
}
 0x3e7   : > { %2431 = dma.vmem_to_hbm [thread:$0]  (%p2665_p5), %s3515_s13, 128, %s3513_s16, %s2244_s28  }
 0x3e8 PF: > { %p2437_p1 = scmp.ge.s32.totalorder %s2577_s27, 2  ;;  %s2270_s14 = sand.u32 1, %s2565_s24  }
 0x3e9   : > { %s2271_s15 = scalar_lea.sflag [#allocation3], %s2270_s14 }
 0x3ea   : > { %p2434_p2 = pnand %p2437_p1, %p2669_p6 }
 0x3ec   : > { %2560 = dma.done.wait (!%p2434_p2), %s2271_s15, 128  }
 0x3ed   : > { %2562 = vsyncadd (!%p2434_p2), %s2271_s15, 4294967168  ;;  %p17_p3 = scmp.ge.s32.totalorder %s2652_s30, 4   ;;  %s3577_s24 = smov %s2569_s25 }
 0x3ee   : > { %s3578_s25 = smov %s2573_s26  ;;  %s3579_s26 = smov %s2663_s10 }
 0x3ef   : > { %s3580_s27 = smov %s2652_s30  ;;  %19 = sbr.rel (!%p17_p3) target bundleno = 3 (0x3), region = 83 }
 0x3f6   :  { %2276 = vsyncpa [#allocation3], 1 }
 0x3f7   :  { %2278 = vsyncpa [#allocation3 + $0x1], 1 }

</bundles_post_ra>
